<compile_context>
chip_gen: v6e
topology: v6e:2x2x1
jax: 0.10.0
libtpu: 0.0.40
codegen_flags: <defaults>
</compile_context>

<pallas_src>
import math

import jax
import jax.numpy as jnp
from jax.experimental import pallas as pl
from jax.experimental.pallas import tpu as pltpu


# ----------------------------- Pallas kernel --------------------------------
def _make_ncf_kernel(E: int):
    """Builds the NCF forward kernel for a static embedding dim E."""

    def ncf_kernel(
        x_ref,                 # (TB, 4E) bf16  packed [mlp_u | mlp_i | gmf_u | gmf_i]
        w1_ref, b1_ref,        # (2E, H1) bf16, (1, H1) f32   first MLP layer
        w2_ref, b2_ref,        # (H1, H2) bf16, (1, H2) f32   second MLP layer
        wpm_ref,               # (1, H2) f32   prediction weights, MLP part
        wpg_ref,               # (1, 2E) f32   prediction weights, GMF part (zero-padded)
        bp_ref,                # (1, 1)  f32
        out_ref,               # (TB, 1) f32
    ):
        f32 = jnp.float32
        x = x_ref[...]                                        # (TB, 4E) bf16

        # ----- MLP branch: lanes [0, 2E) = concat(mlp_user, mlp_item) ----------
        mlp_x = x[:, : 2 * E]                                 # 128-lane-aligned slice
        h1 = jnp.dot(mlp_x, w1_ref[...],
                     preferred_element_type=f32) + b1_ref[...]        # (TB, H1)
        h1 = jnp.maximum(h1, 0.0)                             # ReLU (dropout = id, eval)
        h2 = jnp.dot(h1.astype(w2_ref.dtype), w2_ref[...],
                     preferred_element_type=f32) + b2_ref[...]        # (TB, H2)
        h2 = jnp.maximum(h2, 0.0)                             # ReLU

        # ----- GMF branch: lanes [2E, 4E) hold [gmf_u | gmf_i] in one block ----
        gmf = x[:, 2 * E :].astype(f32)                       # (TB, 2E) f32
        gmf_rot = pltpu.roll(gmf, shift=E, axis=1)            # lanes [gmf_i | gmf_u] (XLU)
        gmf_prod = gmf * gmf_rot                              # lanes [u*i | i*u]

        # ----- prediction head: N=1 -> VPU broadcast-mul + lane reduce ---------
        # wpg is zero-padded over the duplicated half, so summing 2E lanes gives
        # exactly sum_j wp_gmf[j] * u[j] * i[j].
        logit = (
            jnp.sum(gmf_prod * wpg_ref[...], axis=-1, keepdims=True)
            + jnp.sum(h2 * wpm_ref[...], axis=-1, keepdims=True)
            + bp_ref[...]
        )                                                     # (TB, 1)

        out_ref[...] = jax.nn.sigmoid(logit) * 5.0

    return ncf_kernel


# ------------------------------ wrapper --------------------------------------
def _pick_tile(batch: int, tile_cap: int) -> int:
    """Largest multiple-of-256 tile <= tile_cap that still leaves >=2 grid steps
    (when the batch permits), so v7x can shard the 'parallel' axis over 2 TCs."""
    cap = max(256, (tile_cap // 256) * 256)
    b256 = pl.cdiv(batch, 256) * 256
    if b256 >= 512:
        tile = min(cap, (b256 // 2) // 256 * 256)
    else:
        tile = 256
    return max(tile, 256)


def ncf_forward(params, user_ids, item_ids, *, tile_cap=4096, input_buffers=2):
    E = params["gmf_user_emb"].shape[1]
    H1 = params["w1"].shape[1]
    H2 = params["w2"].shape[1]

    B = user_ids.shape[0]
    tile_b = _pick_tile(B, tile_cap)
    B_pad = pl.cdiv(B, tile_b) * tile_b
    pad = B_pad - B
    if pad:
        user_ids = jnp.pad(user_ids, (0, pad))
        item_ids = jnp.pad(item_ids, (0, pad))

    # Embedding lookups (pure gather) stay in XLA; all four rows are packed into
    # ONE (B_pad, 4E) bf16 slab -> a single lane-dense input DMA per tile.
    # Pack order: [mlp_u | mlp_i | gmf_u | gmf_i].
    x = jnp.concatenate(
        [jnp.take(params["mlp_user_emb"], user_ids, axis=0),
         jnp.take(params["mlp_item_emb"], item_ids, axis=0),
         jnp.take(params["gmf_user_emb"], user_ids, axis=0),
         jnp.take(params["gmf_item_emb"], item_ids, axis=0)],
        axis=-1,
    )                                                          # (B_pad, 4E) bf16

    # GMF head weights zero-padded to 2E (second half multiplies the duplicated
    # i*u lanes and must be zero).
    wpg_pad = jnp.concatenate(
        [params["wp_gmf"], jnp.zeros((1, E), params["wp_gmf"].dtype)], axis=-1)

    grid = (B_pad // tile_b,)

    act_kwargs = {}
    if input_buffers != 2:          # v5e knob: deeper buffering if DMA is exposed
        act_kwargs["pipeline_mode"] = pl.Buffered(input_buffers)
    act_spec = pl.BlockSpec((tile_b, 4 * E), lambda i: (i, 0), **act_kwargs)
    res = lambda r, c: pl.BlockSpec((r, c), lambda i: (0, 0))   # resident weights

    flops = 2 * B_pad * (2 * E * H1 + H1 * H2) + B_pad * (4 * E + 3 * H2)
    bytes_accessed = (
        B_pad * 4 * E * 2                       # packed bf16 embedding slab
        + (2 * E * H1 + H1 * H2) * 2            # bf16 weights
        + (H1 + H2 + H2 + 2 * E + 1) * 4        # fp32 biases + head rows
        + B_pad * 4                             # fp32 output
    )
    cost = pl.CostEstimate(flops=flops, transcendentals=B_pad,
                           bytes_accessed=bytes_accessed)

    out = pl.pallas_call(
        _make_ncf_kernel(E),
        out_shape=jax.ShapeDtypeStruct((B_pad, 1), jnp.float32),
        grid=grid,
        in_specs=[
            act_spec,               # packed activations
            res(2 * E, H1),         # w1
            res(1, H1),             # b1
            res(H1, H2),            # w2
            res(1, H2),             # b2
            res(1, H2),             # wp_mlp
            res(1, 2 * E),          # wp_gmf (zero-padded)
            res(1, 1),              # bp
        ],
        out_specs=pl.BlockSpec((tile_b, 1), lambda i: (i, 0)),
        compiler_params=pltpu.CompilerParams(
            dimension_semantics=("parallel",),   # v7x: shard batch tiles over 2 TCs
            vmem_limit_bytes=32 * 1024 * 1024,   # ~8-15 MiB used at tile_b=4096
        ),
        cost_estimate=cost,
    )(
        x,
        params["w1"], params["b1"],
        params["w2"], params["b2"],
        params["wp_mlp"], wpg_pad, params["bp"],
    )

    # torch.sigmoid(prediction).squeeze() * 5.0  (drop batch padding)
    return out[:B, 0]


# --------------------------- parameter init -----------------------------------
def xavier_normal(key, fan_in, fan_out, shape, dtype):
    std = math.sqrt(2.0 / (fan_in + fan_out))
    return (std * jax.random.normal(key, shape)).astype(dtype)


def init_params(key, num_users, num_items, embedding_dim, hidden_layers):
    assert len(hidden_layers) == 2, "kernel is written for two MLP hidden layers"
    E, H1, H2 = embedding_dim, hidden_layers[0], hidden_layers[1]
    bf16, f32 = jnp.bfloat16, jnp.float32
    keys = jax.random.split(key, 8)

    # Embedding tables: xavier_normal_ over (num_rows, embedding_dim); bf16 storage.
    p = {
        "gmf_user_emb": xavier_normal(keys[0], num_users, E, (num_users, E), bf16),
        "gmf_item_emb": xavier_normal(keys[1], num_items, E, (num_items, E), bf16),
        "mlp_user_emb": xavier_normal(keys[2], num_users, E, (num_users, E), bf16),
        "mlp_item_emb": xavier_normal(keys[3], num_items, E, (num_items, E), bf16),
    }

    # MLP layer 1: Linear(2E -> H1). PyTorch weight (H1, 2E); stored transposed.
    p["w1"] = xavier_normal(keys[4], 2 * E, H1, (2 * E, H1), bf16)
    p["b1"] = jnp.zeros((1, H1), f32)

    # MLP layer 2: Linear(H1 -> H2)
    p["w2"] = xavier_normal(keys[5], H1, H2, (H1, H2), bf16)
    p["b2"] = jnp.zeros((1, H2), f32)

    # Prediction: Linear(E + H2 -> 1); stored as a (1, E+H2) row.
    # PyTorch concatenates [gmf_output, mlp_output] -> first E cols are GMF,
    # last H2 cols are MLP.
    wp = xavier_normal(keys[6], E + H2, 1, (1, E + H2), f32)
    p["wp_gmf"] = wp[:, :E]
    p["wp_mlp"] = wp[:, E:]
    p["bp"] = jnp.zeros((1, 1), f32)
    return p


# --------------------------- reference (pure JAX) ------------------------------
def ncf_reference(params, user_ids, item_ids):
    f32 = jnp.float32
    gmf_u = jnp.take(params["gmf_user_emb"], user_ids, axis=0)
    gmf_i = jnp.take(params["gmf_item_emb"], item_ids, axis=0)
    mlp_u = jnp.take(params["mlp_user_emb"], user_ids, axis=0)
    mlp_i = jnp.take(params["mlp_item_emb"], item_ids, axis=0)

    gmf = gmf_u.astype(f32) * gmf_i.astype(f32)
    x = jnp.concatenate([mlp_u, mlp_i], axis=-1)
    h1 = jnp.maximum(
        jnp.dot(x, params["w1"], preferred_element_type=f32) + params["b1"], 0.0)
    h2 = jnp.maximum(
        jnp.dot(h1.astype(jnp.bfloat16), params["w2"],
                preferred_element_type=f32) + params["b2"], 0.0)
    logit = (jnp.sum(gmf * params["wp_gmf"], axis=-1, keepdims=True)
             + jnp.sum(h2 * params["wp_mlp"], axis=-1, keepdims=True)
             + params["bp"])
    return (jax.nn.sigmoid(logit) * 5.0)[:, 0]


# --------------------------------- main ----------------------------------------
if __name__ == "__main__":
    key = jax.random.PRNGKey(0)
    k_param, k_user, k_item = jax.random.split(key, 3)

    num_users, num_items = 100, 200
    embedding_dim = 64
    hidden_layers = [128, 64]
    batch = 8

    params = init_params(k_param, num_users, num_items, embedding_dim, hidden_layers)
    user_ids = jax.random.randint(k_user, (batch,), 0, num_users, dtype=jnp.int32)
    item_ids = jax.random.randint(k_item, (batch,), 0, num_items, dtype=jnp.int32)

    out = ncf_forward(params, user_ids, item_ids)
    out = jax.block_until_ready(out)

    ref = ncf_reference(params, user_ids, item_ids)
    assert out.shape == (batch,), out.shape
    # bf16 embedding/weight storage with fp32 accumulation -> 2e-3 tolerance.
    assert jnp.allclose(out, ref, atol=2e-3, rtol=2e-3), (out, ref)

    print("KERNEL_OK")
</pallas_src>

<mosaic_0001>
module attributes {stable_mosaic.version = 11 : i64} {
  func.func @ncf_kernel(%arg0: i32, %arg1: memref<256x256xbf16, #tpu.memory_space<vmem>>, %arg2: memref<128x128xbf16, #tpu.memory_space<vmem>>, %arg3: memref<1x128xf32, #tpu.memory_space<vmem>>, %arg4: memref<128x64xbf16, #tpu.memory_space<vmem>>, %arg5: memref<1x64xf32, #tpu.memory_space<vmem>>, %arg6: memref<1x64xf32, #tpu.memory_space<vmem>>, %arg7: memref<1x128xf32, #tpu.memory_space<vmem>>, %arg8: memref<1x1xf32, #tpu.memory_space<vmem>>, %arg9: memref<256x1xf32, #tpu.memory_space<vmem>>) attributes {dimension_semantics = [#tpu.dimension_semantics<parallel>], iteration_bounds = array<i64: 1>, scalar_prefetch = 0 : i64, scratch_operands = 0 : i64, tpu.core_type = #tpu.core_type<tc>, window_params = [{transform_indices = @transform_0, window_bounds = array<i64: 256, 256>}, {pipeline_mode = #tpu.pipeline_mode<synchronous>, transform_indices = @transform_1, window_bounds = array<i64: 128, 128>}, {pipeline_mode = #tpu.pipeline_mode<synchronous>, transform_indices = @transform_2, window_bounds = array<i64: 1, 128>}, {pipeline_mode = #tpu.pipeline_mode<synchronous>, transform_indices = @transform_3, window_bounds = array<i64: 128, 64>}, {pipeline_mode = #tpu.pipeline_mode<synchronous>, transform_indices = @transform_4, window_bounds = array<i64: 1, 64>}, {pipeline_mode = #tpu.pipeline_mode<synchronous>, transform_indices = @transform_5, window_bounds = array<i64: 1, 64>}, {pipeline_mode = #tpu.pipeline_mode<synchronous>, transform_indices = @transform_6, window_bounds = array<i64: 1, 128>}, {pipeline_mode = #tpu.pipeline_mode<synchronous>, transform_indices = @transform_7, window_bounds = array<i64: 1, 1>}, {transform_indices = @transform_8, window_bounds = array<i64: 256, 1>}]} {
    %c0 = arith.constant 0 : index
    %c0_0 = arith.constant 0 : index
    %0 = vector.load %arg1[%c0, %c0_0] : memref<256x256xbf16, #tpu.memory_space<vmem>>, vector<256x256xbf16>
    %1 = vector.extract_strided_slice %0 {offsets = [0, 0], sizes = [256, 128], strides = [1, 1]} : vector<256x256xbf16> to vector<256x128xbf16>
    %c0_1 = arith.constant 0 : index
    %c0_2 = arith.constant 0 : index
    %2 = vector.load %arg2[%c0_1, %c0_2] : memref<128x128xbf16, #tpu.memory_space<vmem>>, vector<128x128xbf16>
    %cst = arith.constant dense<0.000000e+00> : vector<256x128xf32>
    %3 = tpu.matmul %1, %2, %cst {dimension_numbers = #tpu.dot_dimension_numbers<[1], [0], [0], [1], [0, 0, 1, 1], [], []>} : vector<256x128xbf16>, vector<128x128xbf16>, vector<256x128xf32> -> vector<256x128xf32>
    %c0_3 = arith.constant 0 : index
    %c0_4 = arith.constant 0 : index
    %4 = vector.load %arg3[%c0_3, %c0_4] : memref<1x128xf32, #tpu.memory_space<vmem>>, vector<1x128xf32>
    %5 = vector.broadcast %4 : vector<1x128xf32> to vector<256x128xf32>
    %6 = arith.addf %3, %5 : vector<256x128xf32>
    %cst_5 = arith.constant 0.000000e+00 : f32
    %7 = vector.broadcast %cst_5 : f32 to vector<256x128xf32>
    %8 = arith.maximumf %6, %7 : vector<256x128xf32>
    %9 = arith.truncf %8 : vector<256x128xf32> to vector<256x128xbf16>
    %c0_6 = arith.constant 0 : index
    %c0_7 = arith.constant 0 : index
    %10 = vector.load %arg4[%c0_6, %c0_7] : memref<128x64xbf16, #tpu.memory_space<vmem>>, vector<128x64xbf16>
    %cst_8 = arith.constant dense<0.000000e+00> : vector<256x64xf32>
    %11 = tpu.matmul %9, %10, %cst_8 {dimension_numbers = #tpu.dot_dimension_numbers<[1], [0], [0], [1], [0, 0, 1, 1], [], []>} : vector<256x128xbf16>, vector<128x64xbf16>, vector<256x64xf32> -> vector<256x64xf32>
    %c0_9 = arith.constant 0 : index
    %c0_10 = arith.constant 0 : index
    %12 = vector.load %arg5[%c0_9, %c0_10] : memref<1x64xf32, #tpu.memory_space<vmem>>, vector<1x64xf32>
    %13 = vector.broadcast %12 : vector<1x64xf32> to vector<256x64xf32>
    %14 = arith.addf %11, %13 : vector<256x64xf32>
    %cst_11 = arith.constant 0.000000e+00 : f32
    %15 = vector.broadcast %cst_11 : f32 to vector<256x64xf32>
    %16 = arith.maximumf %14, %15 : vector<256x64xf32>
    %17 = vector.extract_strided_slice %0 {offsets = [0, 128], sizes = [256, 128], strides = [1, 1]} : vector<256x256xbf16> to vector<256x128xbf16>
    %18 = arith.extf %17 : vector<256x128xbf16> to vector<256x128xf32>
    %c64_i32 = arith.constant 64 : i32
    %19 = tpu.dynamic_rotate %18 by %c64_i32 dim 1 : vector<256x128xf32>, i32 -> vector<256x128xf32>
    %20 = arith.mulf %18, %19 : vector<256x128xf32>
    %c0_12 = arith.constant 0 : index
    %c0_13 = arith.constant 0 : index
    %21 = vector.load %arg7[%c0_12, %c0_13] : memref<1x128xf32, #tpu.memory_space<vmem>>, vector<1x128xf32>
    %22 = vector.broadcast %21 : vector<1x128xf32> to vector<256x128xf32>
    %23 = arith.mulf %20, %22 : vector<256x128xf32>
    %cst_14 = arith.constant dense<0.000000e+00> : vector<256xf32>
    %24 = vector.multi_reduction <add>, %23, %cst_14 [1] : vector<256x128xf32> to vector<256xf32>
    %25 = vector.shape_cast %24 : vector<256xf32> to vector<256x1xf32>
    %c0_15 = arith.constant 0 : index
    %c0_16 = arith.constant 0 : index
    %26 = vector.load %arg6[%c0_15, %c0_16] : memref<1x64xf32, #tpu.memory_space<vmem>>, vector<1x64xf32>
    %27 = vector.broadcast %26 : vector<1x64xf32> to vector<256x64xf32>
    %28 = arith.mulf %16, %27 : vector<256x64xf32>
    %cst_17 = arith.constant dense<0.000000e+00> : vector<256xf32>
    %29 = vector.multi_reduction <add>, %28, %cst_17 [1] : vector<256x64xf32> to vector<256xf32>
    %30 = vector.shape_cast %29 : vector<256xf32> to vector<256x1xf32>
    %31 = arith.addf %25, %30 : vector<256x1xf32>
    %c0_18 = arith.constant 0 : index
    %c0_19 = arith.constant 0 : index
    %32 = vector.load %arg8[%c0_18, %c0_19] : memref<1x1xf32, #tpu.memory_space<vmem>>, vector<1x1xf32>
    %33 = vector.broadcast %32 : vector<1x1xf32> to vector<256x1xf32>
    %34 = arith.addf %31, %33 : vector<256x1xf32>
    %35 = arith.negf %34 : vector<256x1xf32>
    %36 = math.exp %35 : vector<256x1xf32>
    %cst_20 = arith.constant 1.000000e+00 : f32
    %37 = vector.broadcast %cst_20 : f32 to vector<256x1xf32>
    %38 = arith.addf %37, %36 : vector<256x1xf32>
    %39 = arith.divf %37, %38 : vector<256x1xf32>
    %cst_21 = arith.constant 5.000000e+00 : f32
    %40 = vector.broadcast %cst_21 : f32 to vector<256x1xf32>
    %41 = arith.mulf %39, %40 : vector<256x1xf32>
    %c0_22 = arith.constant 0 : index
    %c0_23 = arith.constant 0 : index
    %42 = vector.load %arg9[%c0_22, %c0_23] : memref<256x1xf32, #tpu.memory_space<vmem>>, vector<256x1xf32>
    tpu.vector_store %arg9[%c0_22, %c0_23], %41 {strides = array<i32>} : memref<256x1xf32, #tpu.memory_space<vmem>>, vector<256x1xf32>,
    return
  }
  func.func @transform_0(%arg0: i32) -> (i32, i32) {
    %c0_i32 = arith.constant 0 : i32
    %c0_i32_0 = arith.constant 0 : i32
    return %arg0, %c0_i32 : i32, i32
  }
  func.func @transform_1(%arg0: i32) -> (i32, i32) {
    %c0_i32 = arith.constant 0 : i32
    %c0_i32_0 = arith.constant 0 : i32
    %c0_i32_1 = arith.constant 0 : i32
    return %c0_i32, %c0_i32_0 : i32, i32
  }
  func.func @transform_2(%arg0: i32) -> (i32, i32) {
    %c0_i32 = arith.constant 0 : i32
    %c0_i32_0 = arith.constant 0 : i32
    %c0_i32_1 = arith.constant 0 : i32
    return %c0_i32, %c0_i32_0 : i32, i32
  }
  func.func @transform_3(%arg0: i32) -> (i32, i32) {
    %c0_i32 = arith.constant 0 : i32
    %c0_i32_0 = arith.constant 0 : i32
    %c0_i32_1 = arith.constant 0 : i32
    return %c0_i32, %c0_i32_0 : i32, i32
  }
  func.func @transform_4(%arg0: i32) -> (i32, i32) {
    %c0_i32 = arith.constant 0 : i32
    %c0_i32_0 = arith.constant 0 : i32
    %c0_i32_1 = arith.constant 0 : i32
    return %c0_i32, %c0_i32_0 : i32, i32
  }
  func.func @transform_5(%arg0: i32) -> (i32, i32) {
    %c0_i32 = arith.constant 0 : i32
    %c0_i32_0 = arith.constant 0 : i32
    %c0_i32_1 = arith.constant 0 : i32
    return %c0_i32, %c0_i32_0 : i32, i32
  }
  func.func @transform_6(%arg0: i32) -> (i32, i32) {
    %c0_i32 = arith.constant 0 : i32
    %c0_i32_0 = arith.constant 0 : i32
    %c0_i32_1 = arith.constant 0 : i32
    return %c0_i32, %c0_i32_0 : i32, i32
  }
  func.func @transform_7(%arg0: i32) -> (i32, i32) {
    %c0_i32 = arith.constant 0 : i32
    %c0_i32_0 = arith.constant 0 : i32
    %c0_i32_1 = arith.constant 0 : i32
    return %c0_i32, %c0_i32_0 : i32, i32
  }
  func.func @transform_8(%arg0: i32) -> (i32, i32) {
    %c0_i32 = arith.constant 0 : i32
    %c0_i32_0 = arith.constant 0 : i32
    return %arg0, %c0_i32 : i32, i32
  }
}

</mosaic_0001>

<bundles_post_ra>
// kernel: tpu_custom_call.1
= control target key start
LH: loop header
LB: loop body
LE: loop exit
PB: predicated region body
PF: predicated region fallthrough
CT: control target
= control target key end

     0   :  { %s2762_s0 = inlined_call_operand.hbm [shape: bf16[256,256], index: 0, kind: input, shape index: {}]   ;;  %s2763_s1 = inlined_call_operand.vmem [shape: bf16[128,128], index: 1, kind: input, shape index: {}]   ;;  %s2764_s2 = inlined_call_operand.vmem [shape: f32[1,128], index: 2, kind: input, shape index: {}]   ;;  %s2765_s3 = inlined_call_operand.vmem [shape: bf16[128,64], index: 3, kind: input, shape index: {}]   ;;  %s2766_s4 = inlined_call_operand.vmem [shape: f32[1,64], index: 4, kind: input, shape index: {}]   ;;  %s2767_s5 = inlined_call_operand.vmem [shape: f32[1,64], index: 5, kind: input, shape index: {}]   ;;  %s2768_s6 = inlined_call_operand.vmem [shape: f32[1,128], index: 6, kind: input, shape index: {}]   ;;  %s2769_s7 = inlined_call_operand.<no memory space> [shape: f32[1,1], index: 7, kind: input, shape index: {}]   ;;  %s2770_s8 = inlined_call_operand.vmem [shape: f32[256,1], index: 8, kind: output, shape index: {}]  }
   0x1   :  { %v13_v0 = vstv %s2769_s7 }
   0x2   :  { %14 = vst [vmem:[#allocation2] sm:$0x1] %v13_v0 }
   0x3   :  { %15 = vsyncpa [#allocation4], 0  ;;  %s1961_s29 = smov [#allocation3]  }
   0x4   :  { %s21_s30 = sshll.u32 %s1961_s29, 4  ;;  %s22_s30 = int_to_ptr.vmem [resolvable:$true] %s21_s30 }
   0x5   :  { %s1947_s9 = scalar_lea.vmem %s22_s30, 4096  ;;  %p1952_p1 = scmp.lt.s32.totalorder %s22_s30, %s22_s30 }
   0x6   :  { %p1948_p0 = scmp.ne.s32.totalorder %s22_s30, %s1947_s9  ;;  %p1953_p2 = scmp.lt.s32.totalorder %s1947_s9, %s1947_s9 }
   0x8   :  { %p1954_p3 = por %p1953_p2, %p1952_p1 }
   0xa   :  { %p1955_p4 = pnand %p1954_p3, %p1948_p0 }
   0xc   :  { %1958 = shalt.err (!%p1955_p4)
}
   0xd   :  { %s1962_s10 = smov 128   ;;  %s1963_s11 = smov 8  }
   0xe   :  { %27 = dma.hbm_to_vmem [thread:$0]  %s2762_s0, 4096, %s22_s30, [#allocation4], %s1962_s10, %s1962_s10, %s1963_s11  }
   0xf   :  { %1959 = dma.done.wait [#allocation4], 4096  }
  0x10   :  { %1960 = vsyncadd [#allocation4], 4294963200  ;;  %v1779_v1 = vld [vmem:[%s2763_s1 + $0x38] sm:$0xff]   ;;  %v1780_v2 = vld [vmem:[%s2763_s1 + $0x30] sm:$0xff]   ;;  %s1964_s19 = smov 64   ;;  %vm1052_vm0 = vcmask 523264  }
  0x11   :  { %1599 = vmatprep.subr.bf16.mxu0 %v1779_v1  ;;  %v1781_v3 = vld [vmem:[%s2763_s1 + $0x28] sm:$0xff]   ;;  %v1782_v4 = vld [vmem:[%s2763_s1 + $0x20] sm:$0xff]   ;;  %v1783_v8 = vld [vmem:[%s2763_s1 + $0x18] sm:$0xff]   ;;  %vm1444_vm1 = vcmask 7168  }
  0x12   :  { %1600 = vmatpush3.bf16.msra.mxu0 %v1779_v1  ;;  %v2028_v5 = vld [vmem:[#allocation3] sm:$0xff]  ;;  %v2030_v6 = vld [vmem:[#allocation3 + $0x8] sm:$0xff]  ;;  %v1803_v10 = vld [vmem:[%s2765_s3 + $0x38] sm:$0xff]  }
  0x13   :  { %1601 = vmatprep.subr.bf16.mxu0 %v1780_v2  ;;  %v1483_v7 = vcombine.low %v2028_v5, %v2030_v6  ;;  %v1784_v9 = vld [vmem:[%s2763_s1 + $0x10] sm:$0xff]   ;;  %v1785_v11 = vld [vmem:[%s2763_s1 + $0x8] sm:$0xff]   ;;  %1647 = vmatprep.subr.bf16.mxu1 %v1803_v10  ;;  %v1786_v14 = vld [vmem:[%s2763_s1] sm:$0xff]   ;;  %v718_v1 = vrot.slane %v2028_v5, 4 }
  0x14   :  { %v1804_v12 = vld [vmem:[%s2765_s3 + $0x30] sm:$0xff]   ;;  %1648 = vmatpush3.bf16.msra.mxu1 %v1803_v10  ;;  %v1805_v13 = vld [vmem:[%s2765_s3 + $0x28] sm:$0xff]   ;;  %v1806_v15 = vld [vmem:[%s2765_s3 + $0x20] sm:$0xff]  }
  0x15   :  { %1615 = vmatprep.mubr.bf16.mxu0 %v1483_v7  ;;  %1649 = vmatprep.subr.bf16.mxu1 %v1804_v12  ;;  %v2058_v16 = vld [vmem:[#allocation3 + $0x10] sm:$0xff]  ;;  %v2060_v17 = vld [vmem:[#allocation3 + $0x18] sm:$0xff]  ;;  %v2062_v18 = vld [vmem:[#allocation3 + $0x20] sm:$0xff] }
  0x16   :  { %1602 = vmatpush3.bf16.msra.mxu0 %v1780_v2  ;;  %v2064_v19 = vld [vmem:[#allocation3 + $0x28] sm:$0xff]  ;;  %v1484_v20 = vcombine.low %v2058_v16, %v2060_v17  ;;  %v1807_v21 = vld [vmem:[%s2765_s3 + $0x18] sm:$0xff]   ;;  %v2077_v25 = vld [vmem:[#allocation3 + $0x40] sm:$0xff]  ;;  %v719_v2 = vrot.slane %v2030_v6, 4  ;;  %v720_v7 = vrot.slane %v2058_v16, 4  ;;  %v722_v6 = vrot.slane %v2062_v18, 4 }
  0x17   :  { %1603 = vmatprep.subr.bf16.mxu0 %v1781_v3  ;;  %v1485_v22 = vcombine.low %v2062_v18, %v2064_v19  ;;  %v2073_v23 = vld [vmem:[#allocation3 + $0x30] sm:$0xff]  ;;  %v2075_v24 = vld [vmem:[#allocation3 + $0x38] sm:$0xff]  ;;  %v2079_v26 = vld [vmem:[#allocation3 + $0x48] sm:$0xff] }
  0x18   :  { %1650 = vmatpush3.bf16.msra.mxu1 %v1804_v12  ;;  %v1486_v27 = vcombine.low %v2073_v23, %v2075_v24  ;;  %v1487_v28 = vcombine.low %v2077_v25, %v2079_v26  ;;  %v2085_v29 = vld [vmem:[#allocation3 + $0x50] sm:$0xff]  ;;  %v2087_v30 = vld [vmem:[#allocation3 + $0x58] sm:$0xff]  ;;  %v2089_v31 = vld [vmem:[#allocation3 + $0x60] sm:$0xff]  ;;  %v2171_v10 = vunpack.c.l.bf16 %v720_v7  ;;  %v723_v12 = vrot.slane %v2064_v19, 4 }
  0x19   :  { %1651 = vmatprep.subr.bf16.mxu1 %v1805_v13  ;;  %v2091_v32 = vld [vmem:[#allocation3 + $0x68] sm:$0xff]  ;;  %v1488_v33 = vcombine.low %v2085_v29, %v2087_v30  ;;  %v2097_v35 = vld [vmem:[#allocation3 + $0x70] sm:$0xff]  ;;  %v2099_v36 = vld [vmem:[#allocation3 + $0x78] sm:$0xff] }
  0x1a   :  { %1604 = vmatpush3.bf16.msra.mxu0 %v1781_v3  ;;  %v1489_v34 = vcombine.low %v2089_v31, %v2091_v32  ;;  %v2101_v37 = vld [vmem:[#allocation3 + $0x80] sm:$0xff]  ;;  %v2103_v38 = vld [vmem:[#allocation3 + $0x88] sm:$0xff]  ;;  %v1490_v39 = vcombine.low %v2097_v35, %v2099_v36  ;;  %v2109_v41 = vld [vmem:[#allocation3 + $0x90] sm:$0xff]  ;;  %v2162_v3 = vunpack.c.l.bf16 %v718_v1  ;;  %v2184_v16 = vunpack.c.l.bf16 %v723_v12 }
  0x1b   :  { %1605 = vmatprep.subr.bf16.mxu0 %v1782_v4  ;;  %v1491_v40 = vcombine.low %v2101_v37, %v2103_v38  ;;  %v2111_v42 = vld [vmem:[#allocation3 + $0x98] sm:$0xff]  ;;  %v2113_v43 = vld [vmem:[#allocation3 + $0xa0] sm:$0xff]  ;;  %v2115_v44 = vld [vmem:[#allocation3 + $0xa8] sm:$0xff] }
  0x1c   :  { %1652 = vmatpush3.bf16.msra.mxu1 %v1805_v13  ;;  %v1492_v45 = vcombine.low %v2109_v41, %v2111_v42  ;;  %v1493_v46 = vcombine.low %v2113_v43, %v2115_v44  ;;  %v2121_v47 = vld [vmem:[#allocation3 + $0xb0] sm:$0xff]  ;;  %v2123_v48 = vld [vmem:[#allocation3 + $0xb8] sm:$0xff]  ;;  %v2125_v49 = vld [vmem:[#allocation3 + $0xc0] sm:$0xff]  ;;  %v724_v13 = vrot.slane %v2073_v23, 4  ;;  %v728_v23 = vrot.slane %v2085_v29, 4 }
  0x1d   :  { %1653 = vmatprep.subr.bf16.mxu1 %v1806_v15  ;;  %v2127_v50 = vld [vmem:[#allocation3 + $0xc8] sm:$0xff]  ;;  %v1494_v51 = vcombine.low %v2121_v47, %v2123_v48  ;;  %v2133_v53 = vld [vmem:[#allocation3 + $0xd0] sm:$0xff]  ;;  %v2135_v54 = vld [vmem:[#allocation3 + $0xd8] sm:$0xff]  ;;  %v740_v1 = vrot.slane %v2121_v47, 4 }
  0x1e   :  { %1606 = vmatpush3.bf16.msra.mxu0 %v1782_v4  ;;  %v1495_v52 = vcombine.low %v2125_v49, %v2127_v50  ;;  %v2137_v55 = vld [vmem:[#allocation3 + $0xe0] sm:$0xff]  ;;  %v2139_v56 = vld [vmem:[#allocation3 + $0xe8] sm:$0xff]  ;;  %v1496_v57 = vcombine.low %v2133_v53, %v2135_v54  ;;  %v2145_v59 = vld [vmem:[#allocation3 + $0xf0] sm:$0xff]  ;;  %v2164_v4 = vunpack.c.l.bf16 %v719_v2  ;;  %v2191_v18 = vunpack.c.l.bf16 %v724_v13 }
  0x1f   :  { %1607 = vmatprep.subr.bf16.mxu0 %v1783_v8  ;;  %v1497_v58 = vcombine.low %v2137_v55, %v2139_v56  ;;  %v2147_v60 = vld [vmem:[#allocation3 + $0xf8] sm:$0xff]  ;;  %v1808_v62 = vld [vmem:[%s2765_s3 + $0x10] sm:$0xff]   ;;  %v1809_v63 = vld [vmem:[%s2765_s3 + $0x8] sm:$0xff]   ;;  %v741_v2 = vrot.slane %v2123_v48, 4  ;;  %v747_v47 = vrot.slane %v2139_v56, 4  ;;  %v748_v12 = vrot.slane %v2145_v59, 4 }
  0x20   :  { %1654 = vmatpush3.bf16.msra.mxu1 %v1806_v15  ;;  %v1498_v61 = vcombine.low %v2145_v59, %v2147_v60  ;;  %v1810_v0 = vld [vmem:[%s2765_s3] sm:$0xff]   ;;  %v2182_v15 = vunpack.c.l.bf16 %v722_v6  ;;  %v746_v6 = vrot.slane %v2137_v55, 4  ;;  %v749_v13 = vrot.slane %v2147_v60, 4 }
  0x21   :  { %1655 = vmatprep.subr.bf16.mxu1 %v1807_v21  ;;  %v2285_v60 = vunpack.c.l.bf16 %v747_v47 }
  0x22   :  { %1608 = vmatpush3.bf16.msra.mxu0 %v1783_v8  ;;  %v721_v8 = vrot.slane %v2060_v17, 4  ;;  %v1709_v17 = vpack.i.bf16 %v2184_v16, %v2182_v15  ;;  %v2283_v59 = vunpack.c.l.bf16 %v746_v6 }
  0x23   :  { %1609 = vmatprep.subr.bf16.mxu0 %v1784_v9 }
  0x24   :  { %1656 = vmatpush3.bf16.msra.mxu1 %v1807_v21  ;;  %v727_v21 = vrot.slane %v2079_v26, 4  ;;  %1710 = vrot.lane.b32.xlu1 %v1709_v17, %s1964_s19 }
  0x25   :  { %1657 = vmatprep.subr.bf16.mxu1 %v1808_v62 }
  0x26   :  { %1610 = vmatpush3.bf16.msra.mxu0 %v1784_v9  ;;  %v1699_v9 = vpack.i.bf16 %v2164_v4, %v2162_v3 }
  0x27   :  { %1611 = vmatprep.subr.bf16.mxu0 %v1785_v11 }
  0x28   :  { %1658 = vmatpush3.bf16.msra.mxu1 %v1808_v62  ;;  %1700 = vrot.lane.b32.xlu0 %v1699_v9, %s1964_s19  ;;  %v738_v62 = vrot.slane %v2113_v43, 4  ;;  %v744_v9 = vrot.slane %v2133_v53, 4 }
  0x29   :  { %1659 = vmatprep.subr.bf16.mxu1 %v1809_v63 }
  0x2a   :  { %1612 = vmatpush3.bf16.msra.mxu0 %v1785_v11  ;;  %v2173_v11 = vunpack.c.l.bf16 %v721_v8  ;;  %v2254_v7 = vunpack.c.l.bf16 %v738_v62  ;;  %v743_v8 = vrot.slane %v2127_v50, 4  ;;  %v2271_v50 = vunpack.c.l.bf16 %v741_v2 }
  0x2b   :  { %1613 = vmatprep.subr.bf16.mxu0 %v1786_v14  ;;  %v2277_v55 = vunpack.c.l.bf16 %v744_v9 }
  0x2c   :  { %1660 = vmatpush3.bf16.msra.mxu1 %v1809_v63  ;;  %v1704_v5 = vpack.i.bf16 %v2173_v11, %v2171_v10  ;;  %v739_v63 = vrot.slane %v2115_v44, 4  ;;  %v742_v44 = vrot.slane %v2125_v49, 4  ;;  %v2269_v49 = vunpack.c.l.bf16 %v740_v1 }
  0x2d   :  { %1661 = vmatprep.subr.bf16.mxu1 %v1810_v0 }
  0x2e   :  { %1614 = vmatpush3.bf16.msra.mxu0 %v1786_v14  ;;  %1705 = vrot.lane.b32.xlu0 %v1704_v5, %s1964_s19  ;;  %v725_v14 = vrot.slane %v2075_v24, 4  ;;  %v729_v24 = vrot.slane %v2087_v30, 4  ;;  %v2256_v43 = vunpack.c.l.bf16 %v739_v63  ;;  %v745_v5 = vrot.slane %v2135_v54, 4 }
  0x2f   :  { %v2273_v53 = vunpack.c.l.bf16 %v742_v44  ;;  %v2275_v54 = vunpack.c.l.bf16 %v743_v8 }
  0x30   :  { %1662 = vmatpush3.bf16.msra.mxu1 %v1810_v0  ;;  %v2193_v19 = vunpack.c.l.bf16 %v725_v14  ;;  %v2211_v29 = vunpack.c.l.bf16 %v729_v24  ;;  %v1749_v48 = vpack.i.bf16 %v2256_v43, %v2254_v7  ;;  %v2279_v56 = vunpack.c.l.bf16 %v745_v5 }
  0x31   :  { %1616 = vmatmul.mubr.bf16.vlgmr.msra.gmra.mxu0 %v1484_v20  ;;  %v726_v20 = vrot.slane %v2077_v25, 4  ;;  %v2202_v25 = vunpack.c.l.bf16 %v727_v21  ;;  %v1754_v14 = vpack.i.bf16 %v2271_v50, %v2269_v49  ;;  %v1759_v17 = vpack.i.bf16 %v2275_v54, %v2273_v53 }
  0x32   :  { %1619 = vmatprep.mubr.bf16.mxu0 %v1485_v22  ;;  %v1714_v22 = vpack.i.bf16 %v2193_v19, %v2191_v18  ;;  %v2292_v21 = vunpack.c.l.bf16 %v748_v12 }
  0x34   :  { %1715 = vrot.lane.b32.xlu1 %v1714_v22, %s1964_s19  ;;  %v2294_v22 = vunpack.c.l.bf16 %v749_v13  ;;  %v2320_v13 = vld [vmem:[%s2768_s6] ss:$0 sm:$0xff] }
  0x36   :  { %v1774_v24 = vpack.i.bf16 %v2294_v22, %v2292_v21 }
  0x39   :  { %1620 = vmatmul.mubr.bf16.gmra.mxu0 %v1486_v27  ;;  %v2200_v27 = vunpack.c.l.bf16 %v726_v20  ;;  %v1764_v20 = vpack.i.bf16 %v2279_v56, %v2277_v55 }
  0x3a   :  { %1623 = vmatprep.mubr.bf16.mxu0 %v1487_v28  ;;  %v730_v28 = vrot.slane %v2089_v31, 4 }
  0x3b   :  { %v1719_v26 = vpack.i.bf16 %v2202_v25, %v2200_v27 }
  0x3d   :  { %1720 = vrot.lane.b32.xlu0 %v1719_v26, %s1964_s19 }
  0x41   :  { %1624 = vmatmul.mubr.bf16.gmra.mxu0 %v1488_v33  ;;  %v731_v33 = vrot.slane %v2091_v32, 4 }
  0x42   :  { %1627 = vmatprep.mubr.bf16.mxu0 %v1489_v34  ;;  %v2209_v34 = vunpack.c.l.bf16 %v728_v23  ;;  %v1769_v23 = vpack.i.bf16 %v2285_v60, %v2283_v59 }
  0x43   :  { %v2220_v31 = vunpack.c.l.bf16 %v731_v33  ;;  %v2307_v33 = vld [vmem:[%s2764_s2] ss:$0 sm:$0xff] }
  0x44   :  { %v1724_v30 = vpack.i.bf16 %v2211_v29, %v2209_v34 }
  0x46   :  { %1725 = vrot.lane.b32.xlu1 %v1724_v30, %s1964_s19 }
  0x49   :  { %1628 = vmatmul.mubr.bf16.gmra.mxu0 %v1490_v39  ;;  %v732_v39 = vrot.slane %v2097_v35, 4 }
  0x4a   :  { %1631 = vmatprep.mubr.bf16.mxu0 %v1491_v40  ;;  %v733_v40 = vrot.slane %v2099_v36, 4 }
  0x4c   :  { %v2229_v35 = vunpack.c.l.bf16 %v733_v40 }
  0x51   :  { %1632 = vmatmul.mubr.bf16.gmra.mxu0 %v1492_v45  ;;  %v2218_v45 = vunpack.c.l.bf16 %v730_v28 }
  0x52   :  { %1635 = vmatprep.mubr.bf16.mxu0 %v1493_v46  ;;  %v734_v46 = vrot.slane %v2101_v37, 4 }
  0x53   :  { %v1729_v32 = vpack.i.bf16 %v2220_v31, %v2218_v45 }
  0x55   :  { %1730 = vrot.lane.b32.xlu0 %v1729_v32, %s1964_s19 }
  0x59   :  { %1636 = vmatmul.mubr.bf16.gmra.mxu0 %v1494_v51  ;;  %v735_v51 = vrot.slane %v2103_v38, 4 }
  0x5a   :  { %1639 = vmatprep.mubr.bf16.mxu0 %v1495_v52  ;;  %v2227_v52 = vunpack.c.l.bf16 %v732_v39 }
  0x5b   :  { %v2238_v37 = vunpack.c.l.bf16 %v735_v51 }
  0x5c   :  { %v1734_v36 = vpack.i.bf16 %v2229_v35, %v2227_v52 }
  0x5e   :  { %1735 = vrot.lane.b32.xlu1 %v1734_v36, %s1964_s19 }
  0x61   :  { %1640 = vmatmul.mubr.bf16.gmra.mxu0 %v1496_v57  ;;  %v736_v57 = vrot.slane %v2109_v41, 4 }
  0x62   :  { %1643 = vmatprep.mubr.bf16.mxu0 %v1497_v58  ;;  %v737_v58 = vrot.slane %v2111_v42, 4 }
  0x63   :  { %v2245_v0 = vunpack.c.l.bf16 %v736_v57 }
  0x64   :  { %v2247_v41 = vunpack.c.l.bf16 %v737_v58 }
  0x66   :  { %v1744_v42 = vpack.i.bf16 %v2247_v41, %v2245_v0 }
  0x68   :  { %1745 = vrot.lane.b32.xlu1 %v1744_v42, %s1964_s19 }
  0x69   :  { %1644 = vmatmul.mubr.bf16.gmra.mxu0 %v1498_v61  ;;  %v2236_v61 = vunpack.c.l.bf16 %v734_v46 }
  0x6b   :  { %v1739_v38 = vpack.i.bf16 %v2238_v37, %v2236_v61 }
  0x6c   :  { %1755 = vrot.lane.b32.xlu1 %v1754_v14, %s1964_s19 }
  0x6d   :  { %1740 = vrot.lane.b32.xlu0 %v1739_v38, %s1964_s19 }
  0x70   :  { %1765 = vrot.lane.b32.xlu1 %v1764_v20, %s1964_s19 }
  0x71   :  { %1750 = vrot.lane.b32.xlu0 %v1749_v48, %s1964_s19 }
  0x74   :  { %1775 = vrot.lane.b32.xlu1 %v1774_v24, %s1964_s19 }
  0x75   :  { %1760 = vrot.lane.b32.xlu0 %v1759_v17, %s1964_s19 }
  0x79   :  { %1770 = vrot.lane.b32.xlu0 %v1769_v23, %s1964_s19 }
  0x9a   :  { %v1701_v5 = vpop.permute.xlu0 %1700 }
  0x9b   :  { %v1703_v47 = vunpack.i.h.bf16 %v1701_v5  ;;  %v1702_v48 = vunpack.i.l.bf16 %v1701_v5 }
  0x9d   :  { %v878_v20 = vmul.f32 %v1702_v48, %v2162_v3  ;;  %v879_v23 = vmul.f32 %v1703_v47, %v2164_v4 }
  0xf1   :  { %v1617_v26 = vpop.f32.mrf.mxu0 }
  0xf2   :  { %v288_v32 = vadd.f32 %v1617_v26, %v2307_v33 }
  0xf3   :  { %v279_v28 = vpop.f32.mrf.mxu0 }
  0xf4   :  { %v280_v39 = vadd.f32 %v2307_v33, %v279_v28  ;;  %v408_v62 = vmax.f32 %v288_v32, 0.0 }
  0xf5   :  { %v1618_v30 = vpop.f32.mrf.mxu0 }
  0xf6   :  { %v291_v40 = vadd.f32 %v1618_v30, %v2307_v33  ;;  %v406_v58 = vmax.f32 %v280_v39, 0.0  ;;  %v1706_v30 = vpop.permute.xlu0 %1705 }
  0xf7   :  { %v282_v46 = vpop.f32.mrf.mxu0  ;;  %v1707_v32 = vunpack.i.l.bf16 %v1706_v30 }
  0xf8   :  { %v283_v51 = vadd.f32 %v2307_v33, %v282_v46  ;;  %v409_v36 = vmax.f32 %v291_v40, 0.0  ;;  %v1708_v40 = vunpack.i.h.bf16 %v1706_v30  ;;  %v917_v46 = vmul.f32 %v2320_v13, %v878_v20 }
  0xf9   :  { %v1621_v57 = vpop.f32.mrf.mxu0  ;;  %v880_v3 = vmul.f32 %v1707_v32, %v2171_v10 }
  0xfa   :  { %v407_v38 = vmax.f32 %v283_v51, 0.0  ;;  %v439_v1 = vpack.c.bf16 %v409_v36, %v408_v62  ;;  %v304_v44 = vadd.f32 %v1621_v57, %v2307_v33  ;;  %v918_v51 = vmul.f32 %v2320_v13, %v879_v23  ;;  %949 = vadd.xlane.f32.xlu0 %v917_v46 }
  0xfb   :  { %v295_v63 = vpop.f32.mrf.mxu0  ;;  %v881_v4 = vmul.f32 %v1708_v40, %v2173_v11 }
  0xfc   :  { %v438_v42 = vpack.c.bf16 %v407_v38, %v406_v58  ;;  %v296_v8 = vadd.f32 %v2307_v33, %v295_v63  ;;  %v412_v24 = vmax.f32 %v304_v44, 0.0  ;;  %951 = vadd.xlane.f32.xlu1 %v918_v51 }
  0xfd   :  { %v1622_v2 = vpop.f32.mrf.mxu0  ;;  %v920_v11 = vmul.f32 %v2320_v13, %v881_v4 }
  0xfe   :  { %v307_v9 = vadd.f32 %v1622_v2, %v2307_v33  ;;  %1663 = vmatprep.mubr.bf16.mxu1 %v438_v42  ;;  %v410_v26 = vmax.f32 %v296_v8, 0.0  ;;  %v1711_v8 = vpop.permute.xlu1 %1710 }
  0xff   :  { %v298_v6 = vpop.f32.mrf.mxu0  ;;  %1664 = vmatmul.mubr.bf16.vlgmr.msra.gmra.mxu1 %v439_v1  ;;  %v919_v1 = vmul.f32 %v2320_v13, %v880_v3  ;;  %v1713_v5 = vunpack.i.h.bf16 %v1711_v8  ;;  %v1712_v10 = vunpack.i.l.bf16 %v1711_v8  ;;  %v1721_v3 = vpop.permute.xlu0 %1720 }
 0x100   :  { %v299_v12 = vadd.f32 %v2307_v33, %v298_v6  ;;  %v413_v14 = vmax.f32 %v307_v9, 0.0 }
 0x101   :  { %v1625_v17 = vpop.f32.mrf.mxu0  ;;  %953 = vadd.xlane.f32.xlu0 %v919_v1 }
 0x102   :  { %v411_v28 = vmax.f32 %v299_v12, 0.0  ;;  %v441_v57 = vpack.c.bf16 %v413_v14, %v412_v24  ;;  %v320_v38 = vadd.f32 %v1625_v17, %v2307_v33  ;;  %v882_v14 = vmul.f32 %v1712_v10, %v2182_v15  ;;  %v1716_v24 = vpop.permute.xlu1 %1715 }
 0x103   :  { %v311_v39 = vpop.f32.mrf.mxu0  ;;  %v883_v17 = vmul.f32 %v1713_v5, %v2184_v16  ;;  %v1717_v30 = vunpack.i.l.bf16 %v1716_v24 }
 0x104   :  { %v440_v36 = vpack.c.bf16 %v411_v28, %v410_v26  ;;  %v312_v62 = vadd.f32 %v2307_v33, %v311_v39  ;;  %v416_v6 = vmax.f32 %v320_v38, 0.0  ;;  %v1718_v28 = vunpack.i.h.bf16 %v1716_v24 }
 0x105   :  { %v1626_v58 = vpop.f32.mrf.mxu0  ;;  %955 = vadd.xlane.f32.xlu0 %v920_v11  ;;  %v921_v39 = vmul.f32 %v2320_v13, %v882_v14  ;;  %v922_v40 = vmul.f32 %v2320_v13, %v883_v17  ;;  %v884_v16 = vmul.f32 %v1717_v30, %v2191_v18  ;;  %v1723_v38 = vunpack.i.h.bf16 %v1721_v3 }
 0x106   :  { %v323_v63 = vadd.f32 %v1626_v58, %v2307_v33  ;;  %1667 = vmatprep.mubr.bf16.mxu1 %v440_v36  ;;  %v414_v47 = vmax.f32 %v312_v62, 0.0  ;;  %v885_v36 = vmul.f32 %v1718_v28, %v2193_v19  ;;  %v1722_v62 = vunpack.i.l.bf16 %v1721_v3  ;;  %v1726_v10 = vpop.permute.xlu1 %1725  ;;  %v1731_v28 = vpop.permute.xlu0 %1730 }
 0x107   :  { %v314_v42 = vpop.f32.mrf.mxu0  ;;  %1668 = vmatmul.mubr.bf16.gmra.mxu1 %v441_v57  ;;  %957 = vadd.xlane.f32.xlu1 %v921_v39  ;;  %v887_v19 = vmul.f32 %v1723_v38, %v2202_v25  ;;  %v1733_v39 = vunpack.i.h.bf16 %v1731_v28 }
 0x108   :  { %v417_v2 = vmax.f32 %v323_v63, 0.0  ;;  %v315_v44 = vadd.f32 %v2307_v33, %v314_v42  ;;  %v923_v63 = vmul.f32 %v2320_v13, %v884_v16  ;;  %v924_v42 = vmul.f32 %v2320_v13, %v885_v36 }
 0x109   :  { %v1629_v9 = vpop.f32.mrf.mxu0  ;;  %959 = vadd.xlane.f32.xlu0 %v922_v40  ;;  %v886_v18 = vmul.f32 %v1722_v62, %v2200_v27  ;;  %v1732_v40 = vunpack.i.l.bf16 %v1731_v28 }
 0x10a   :  { %v415_v48 = vmax.f32 %v315_v44, 0.0  ;;  %v443_v20 = vpack.c.bf16 %v417_v2, %v416_v6  ;;  %v336_v32 = vadd.f32 %v1629_v9, %v2307_v33  ;;  %v1728_v6 = vunpack.i.h.bf16 %v1726_v10  ;;  %v1736_v3 = vpop.permute.xlu1 %1735 }
 0x10b   :  { %v327_v12 = vpop.f32.mrf.mxu0  ;;  %961 = vadd.xlane.f32.xlu1 %v923_v63  ;;  %v1738_v38 = vunpack.i.h.bf16 %v1736_v3  ;;  %v1737_v62 = vunpack.i.l.bf16 %v1736_v3 }
 0x10c   :  { %v442_v23 = vpack.c.bf16 %v415_v48, %v414_v47  ;;  %v328_v46 = vadd.f32 %v2307_v33, %v327_v12  ;;  %v420_v1 = vmax.f32 %v336_v32, 0.0  ;;  %v1727_v47 = vunpack.i.l.bf16 %v1726_v10 }
 0x10d   :  { %v1630_v26 = vpop.f32.mrf.mxu0  ;;  %v925_v48 = vmul.f32 %v2320_v13, %v886_v18  ;;  %963 = vadd.xlane.f32.xlu0 %v924_v42  ;;  %v926_v12 = vmul.f32 %v2320_v13, %v887_v19 }
 0x10e   :  { %v339_v51 = vadd.f32 %v1630_v26, %v2307_v33  ;;  %1671 = vmatprep.mubr.bf16.mxu1 %v442_v23  ;;  %v418_v2 = vmax.f32 %v328_v46, 0.0  ;;  %v888_v25 = vmul.f32 %v1727_v47, %v2209_v34  ;;  %v889_v23 = vmul.f32 %v1728_v6, %v2211_v29 }
 0x10f   :  { %v330_v15 = vpop.f32.mrf.mxu0  ;;  %1672 = vmatmul.mubr.bf16.gmra.mxu1 %v443_v20  ;;  %965 = vadd.xlane.f32.xlu1 %v925_v48  ;;  %v890_v34 = vmul.f32 %v1732_v40, %v2218_v45  ;;  %v891_v29 = vmul.f32 %v1733_v39, %v2220_v31  ;;  %v892_v31 = vmul.f32 %v1737_v62, %v2227_v52 }
 0x110   :  { %v421_v57 = vmax.f32 %v339_v51, 0.0  ;;  %v331_v58 = vadd.f32 %v2307_v33, %v330_v15  ;;  %v927_v32 = vmul.f32 %v2320_v13, %v888_v25  ;;  %v928_v46 = vmul.f32 %v2320_v13, %v889_v23  ;;  %v1746_v25 = vpop.permute.xlu1 %1745 }
 0x111   :  { %v1633_v4 = vpop.f32.mrf.mxu0  ;;  %967 = vadd.xlane.f32.xlu0 %v926_v12  ;;  %v929_v63 = vmul.f32 %v2320_v13, %v890_v34  ;;  %v930_v42 = vmul.f32 %v2320_v13, %v891_v29  ;;  %v931_v6 = vmul.f32 %v2320_v13, %v892_v31 }
 0x112   :  { %v419_v44 = vmax.f32 %v331_v58, 0.0  ;;  %v445_v9 = vpack.c.bf16 %v421_v57, %v420_v1  ;;  %v352_v14 = vadd.f32 %v1633_v4, %v2307_v33 }
 0x113   :  { %v343_v8 = vpop.f32.mrf.mxu0  ;;  %969 = vadd.xlane.f32.xlu1 %v927_v32 }
 0x114   :  { %v444_v5 = vpack.c.bf16 %v419_v44, %v418_v2  ;;  %v344_v17 = vadd.f32 %v2307_v33, %v343_v8  ;;  %v424_v51 = vmax.f32 %v352_v14, 0.0  ;;  %v893_v8 = vmul.f32 %v1738_v38, %v2229_v35 }
 0x115   :  { %v1634_v11 = vpop.f32.mrf.mxu0  ;;  %971 = vadd.xlane.f32.xlu0 %v928_v46 }
 0x116   :  { %v355_v20 = vadd.f32 %v1634_v11, %v2307_v33  ;;  %1675 = vmatprep.mubr.bf16.mxu1 %v444_v5  ;;  %v422_v15 = vmax.f32 %v344_v17, 0.0  ;;  %v932_v47 = vmul.f32 %v2320_v13, %v893_v8 }
 0x117   :  { %v346_v27 = vpop.f32.mrf.mxu0  ;;  %1676 = vmatmul.mubr.bf16.gmra.mxu1 %v445_v9  ;;  %973 = vadd.xlane.f32.xlu1 %v929_v63  ;;  %v1741_v9 = vpop.permute.xlu0 %1740 }
 0x118   :  { %v425_v24 = vmax.f32 %v355_v20, 0.0  ;;  %v347_v26 = vadd.f32 %v2307_v33, %v346_v27  ;;  %v1743_v10 = vunpack.i.h.bf16 %v1741_v9  ;;  %v1742_v11 = vunpack.i.l.bf16 %v1741_v9 }
 0x119   :  { %v1637_v30 = vpop.f32.mrf.mxu0  ;;  %975 = vadd.xlane.f32.xlu0 %v930_v42 }
 0x11a   :  { %v423_v16 = vmax.f32 %v347_v26, 0.0  ;;  %v447_v57 = vpack.c.bf16 %v425_v24, %v424_v51  ;;  %v368_v1 = vadd.f32 %v1637_v30, %v2307_v33  ;;  %v894_v52 = vmul.f32 %v1742_v11, %v2236_v61 }
 0x11b   :  { %v359_v36 = vpop.f32.mrf.mxu0  ;;  %977 = vadd.xlane.f32.xlu1 %v931_v6  ;;  %v895_v35 = vmul.f32 %v1743_v10, %v2238_v37  ;;  %v1748_v24 = vunpack.i.h.bf16 %v1746_v25  ;;  %v1747_v26 = vunpack.i.l.bf16 %v1746_v25 }
 0x11c   :  { %v446_v58 = vpack.c.bf16 %v423_v16, %v422_v15  ;;  %v360_v2 = vadd.f32 %v2307_v33, %v359_v36  ;;  %v428_v48 = vmax.f32 %v368_v1, 0.0  ;;  %v933_v28 = vmul.f32 %v2320_v13, %v894_v52  ;;  %v1751_v16 = vpop.permute.xlu0 %1750  ;;  %v1756_v1 = vpop.permute.xlu1 %1755 }
 0x11d   :  { %v1638_v4 = vpop.f32.mrf.mxu0  ;;  %979 = vadd.xlane.f32.xlu0 %v932_v47  ;;  %v934_v30 = vmul.f32 %v2320_v13, %v895_v35  ;;  %v896_v37 = vmul.f32 %v1747_v26, %v2245_v0  ;;  %v897_v46 = vmul.f32 %v1748_v24, %v2247_v41  ;;  %v1753_v34 = vunpack.i.h.bf16 %v1751_v16 }
 0x11e   :  { %v371_v44 = vadd.f32 %v1638_v4, %v2307_v33  ;;  %1679 = vmatprep.mubr.bf16.mxu1 %v446_v58  ;;  %v426_v12 = vmax.f32 %v360_v2, 0.0  ;;  %v1752_v29 = vunpack.i.l.bf16 %v1751_v16 }
 0x11f   :  { %v362_v45 = vpop.f32.mrf.mxu0  ;;  %1680 = vmatmul.mubr.bf16.gmra.mxu1 %v447_v57  ;;  %981 = vadd.xlane.f32.xlu1 %v933_v28  ;;  %v935_v57 = vmul.f32 %v2320_v13, %v896_v37  ;;  %v936_v58 = vmul.f32 %v2320_v13, %v897_v46  ;;  %v899_v41 = vmul.f32 %v1753_v34, %v2256_v43 }
 0x120   :  { %v429_v18 = vmax.f32 %v371_v44, 0.0  ;;  %v363_v19 = vadd.f32 %v2307_v33, %v362_v45  ;;  %v898_v0 = vmul.f32 %v1752_v29, %v2254_v7  ;;  %v1758_v44 = vunpack.i.h.bf16 %v1756_v1  ;;  %v1761_v8 = vpop.permute.xlu0 %1760  ;;  %v2413_v29 = vld [vmem:[%s2766_s4] ss:$0 sm:$0xff] }
 0x121   :  { %v1641_v5 = vpop.f32.mrf.mxu0  ;;  %983 = vadd.xlane.f32.xlu0 %v934_v30  ;;  %v1757_v45 = vunpack.i.l.bf16 %v1756_v1  ;;  %v1763_v7 = vunpack.i.h.bf16 %v1761_v8 }
 0x122   :  { %v427_v14 = vmax.f32 %v363_v19, 0.0  ;;  %v449_v20 = vpack.c.bf16 %v429_v18, %v428_v48  ;;  %v384_v39 = vadd.f32 %v1641_v5, %v2307_v33  ;;  %v937_v31 = vmul.f32 %v2320_v13, %v898_v0 }
 0x123   :  { %v375_v17 = vpop.f32.mrf.mxu0  ;;  %985 = vadd.xlane.f32.xlu1 %v935_v57  ;;  %v938_v18 = vmul.f32 %v2320_v13, %v899_v41  ;;  %v1762_v5 = vunpack.i.l.bf16 %v1761_v8  ;;  %v900_v11 = vmul.f32 %v1757_v45, %v2269_v49  ;;  %v901_v6 = vmul.f32 %v1758_v44, %v2271_v50 }
 0x124   :  { %v448_v27 = vpack.c.bf16 %v427_v14, %v426_v12  ;;  %v376_v40 = vadd.f32 %v2307_v33, %v375_v17  ;;  %v432_v3 = vmax.f32 %v384_v39, 0.0  ;;  %v1766_v12 = vpop.permute.xlu1 %1765  ;;  %v903_v17 = vmul.f32 %v1763_v7, %v2275_v54  ;;  %v1771_v25 = vpop.permute.xlu0 %1770 }
 0x125   :  { %v1642_v23 = vpop.f32.mrf.mxu0  ;;  %987 = vadd.xlane.f32.xlu0 %v936_v58  ;;  %v902_v14 = vmul.f32 %v1762_v5, %v2273_v53  ;;  %v939_v52 = vmul.f32 %v2320_v13, %v900_v11  ;;  %v1768_v35 = vunpack.i.h.bf16 %v1766_v12  ;;  %v1773_v37 = vunpack.i.h.bf16 %v1771_v25  ;;  %v2419_v58 = vld [vmem:[%s2767_s5] ss:$0 sm:$0xff] }
 0x126   :  { %v387_v32 = vadd.f32 %v1642_v23, %v2307_v33  ;;  %1683 = vmatprep.mubr.bf16.mxu1 %v448_v27  ;;  %v430_v4 = vmax.f32 %v376_v40, 0.0  ;;  %v940_v27 = vmul.f32 %v2320_v13, %v901_v6  ;;  %v942_v54 = vmul.f32 %v2320_v13, %v903_v17 }
 0x127   :  { %v378_v61 = vpop.f32.mrf.mxu0  ;;  %1684 = vmatmul.mubr.bf16.gmra.mxu1 %v449_v20  ;;  %989 = vadd.xlane.f32.xlu1 %v937_v31  ;;  %v1767_v20 = vunpack.i.l.bf16 %v1766_v12  ;;  %v941_v50 = vmul.f32 %v2320_v13, %v902_v14  ;;  %v905_v30 = vmul.f32 %v1768_v35, %v2279_v56 }
 0x128   :  { %v433_v51 = vmax.f32 %v387_v32, 0.0  ;;  %v379_v15 = vadd.f32 %v2307_v33, %v378_v61  ;;  %v1776_v32 = vpop.permute.xlu1 %1775 }
 0x129   :  { %v1645_v36 = vpop.f32.mrf.mxu0  ;;  %991 = vadd.xlane.f32.xlu0 %v938_v18  ;;  %v904_v26 = vmul.f32 %v1767_v20, %v2277_v55  ;;  %v944_v61 = vmul.f32 %v2320_v13, %v905_v30  ;;  %v1777_v55 = vunpack.i.l.bf16 %v1776_v32 }
 0x12a   :  { %v431_v38 = vmax.f32 %v379_v15, 0.0  ;;  %v451_v63 = vpack.c.bf16 %v433_v51, %v432_v3  ;;  %v400_v43 = vadd.f32 %v1645_v36, %v2307_v33  ;;  %v1778_v51 = vunpack.i.h.bf16 %v1776_v32 }
 0x12b   :  { %v391_v62 = vpop.f32.mrf.mxu0  ;;  %993 = vadd.xlane.f32.xlu1 %v939_v52  ;;  %v943_v39 = vmul.f32 %v2320_v13, %v904_v26  ;;  %v908_v56 = vmul.f32 %v1777_v55, %v2292_v21  ;;  %v907_v15 = vmul.f32 %v1773_v37, %v2285_v60 }
 0x12c   :  { %v450_v42 = vpack.c.bf16 %v431_v38, %v430_v4  ;;  %v392_v19 = vadd.f32 %v2307_v33, %v391_v62  ;;  %v436_v24 = vmax.f32 %v400_v43, 0.0  ;;  %v909_v36 = vmul.f32 %v1778_v51, %v2294_v22 }
 0x12d   :  { %v1646_v2 = vpop.f32.mrf.mxu0  ;;  %995 = vadd.xlane.f32.xlu0 %v940_v27  ;;  %v947_v16 = vmul.f32 %v2320_v13, %v908_v56 }
 0x12e   :  { %v403_v9 = vadd.f32 %v1646_v2, %v2307_v33  ;;  %1687 = vmatprep.mubr.bf16.mxu1 %v450_v42  ;;  %v434_v23 = vmax.f32 %v392_v19, 0.0  ;;  %v948_v34 = vmul.f32 %v2320_v13, %v909_v36 }
 0x12f   :  { %v394_v10 = vpop.f32.mrf.mxu0  ;;  %1688 = vmatmul.mubr.bf16.gmra.mxu1 %v451_v63  ;;  %997 = vadd.xlane.f32.xlu1 %v941_v50 }
 0x130   :  { %v437_v47 = vmax.f32 %v403_v9, 0.0  ;;  %v395_v48 = vadd.f32 %v2307_v33, %v394_v10  ;;  %v1772_v33 = vunpack.i.l.bf16 %v1771_v25 }
 0x131   :  { %999 = vadd.xlane.f32.xlu0 %v942_v54 }
 0x132   :  { %v435_v49 = vmax.f32 %v395_v48, 0.0  ;;  %v453_v28 = vpack.c.bf16 %v437_v47, %v436_v24  ;;  %v906_v40 = vmul.f32 %v1772_v33, %v2283_v59  ;;  %v946_v59 = vmul.f32 %v2320_v13, %v907_v15 }
 0x133   :  { %1001 = vadd.xlane.f32.xlu1 %v943_v39 }
 0x134   :  { %v452_v53 = vpack.c.bf16 %v435_v49, %v434_v23  ;;  %v945_v46 = vmul.f32 %v2320_v13, %v906_v40 }
 0x135   :  { %1003 = vadd.xlane.f32.xlu0 %v944_v61 }
 0x136   :  { %1691 = vmatprep.mubr.bf16.mxu1 %v452_v53 }
 0x137   :  { %1692 = vmatmul.mubr.bf16.gmra.mxu1 %v453_v28  ;;  %1005 = vadd.xlane.f32.xlu1 %v945_v46 }
 0x139   :  { %1007 = vadd.xlane.f32.xlu0 %v946_v59 }
 0x13b   :  { %1009 = vadd.xlane.f32.xlu1 %v947_v16 }
 0x13d   :  { %1011 = vadd.xlane.f32.xlu0 %v948_v34 }
 0x1bf   :  { %v1665_v57 = vpop.f32.mrf.mxu1 }
 0x1c0   :  { %v568_v21 = vadd.f32 %v1665_v57, %v2413_v29 }
 0x1c1   :  { %v559_v60 = vpop.f32.mrf.mxu1 }
 0x1c2   :  { %v688_v3 = vmax.f32 %v568_v21, 0.0  ;;  %v560_v22 = vadd.f32 %v2413_v29, %v559_v60 }
 0x1c3   :  { %v1666_v4 = vpop.f32.mrf.mxu1 }
 0x1c4   :  { %v686_v13 = vmax.f32 %v560_v22, 0.0  ;;  %v571_v38 = vadd.f32 %v1666_v4, %v2413_v29  ;;  %v1022_v62 = vmul.f32 %v2419_v58, %v688_v3 }
 0x1c5   :  { %v562_v0 = vpop.f32.mrf.mxu1 }
 0x1c6   :  { %v689_v41 = vmax.f32 %v571_v38, 0.0  ;;  %v563_v63 = vadd.f32 %v2413_v29, %v562_v0  ;;  %v1059_v42 = vsel %vm1052_vm0, %v1022_v62, 0.0  ;;  %v1020_v1 = vmul.f32 %v2419_v58, %v686_v13 }
 0x1c7   :  { %1060 = vadd.xlane.f32.xlu1 %v1059_v42  ;;  %v1669_v2 = vpop.f32.mrf.mxu1 }
 0x1c8   :  { %v687_v44 = vmax.f32 %v563_v63, 0.0  ;;  %v584_v45 = vadd.f32 %v1669_v2, %v2413_v29  ;;  %v1023_v31 = vmul.f32 %v2419_v58, %v689_v41  ;;  %v1053_v18 = vsel %vm1052_vm0, %v1020_v1, 0.0 }
 0x1c9   :  { %v575_v8 = vpop.f32.mrf.mxu1 }
 0x1ca   :  { %v692_v19 = vmax.f32 %v584_v45, 0.0  ;;  %v576_v9 = vadd.f32 %v2413_v29, %v575_v8  ;;  %v1062_v7 = vsel %vm1052_vm0, %v1023_v31, 0.0  ;;  %v1021_v5 = vmul.f32 %v2419_v58, %v687_v44 }
 0x1cb   :  { %1063 = vadd.xlane.f32.xlu0 %v1062_v7  ;;  %v1670_v43 = vpop.f32.mrf.mxu1  ;;  %1054 = vadd.xlane.f32.xlu1 %v1053_v18 }
 0x1cc   :  { %v690_v10 = vmax.f32 %v576_v9, 0.0  ;;  %v587_v11 = vadd.f32 %v1670_v43, %v2413_v29  ;;  %v1026_v6 = vmul.f32 %v2419_v58, %v692_v19  ;;  %v1056_v48 = vsel %vm1052_vm0, %v1021_v5, 0.0 }
 0x1cd   :  { %v578_v47 = vpop.f32.mrf.mxu1 }
 0x1ce   :  { %v693_v12 = vmax.f32 %v587_v11, 0.0  ;;  %v579_v14 = vadd.f32 %v2413_v29, %v578_v47  ;;  %v1071_v17 = vsel %vm1052_vm0, %v1026_v6, 0.0  ;;  %v1024_v52 = vmul.f32 %v2419_v58, %v690_v10 }
 0x1cf   :  { %v1673_v35 = vpop.f32.mrf.mxu1  ;;  %1057 = vadd.xlane.f32.xlu0 %v1056_v48  ;;  %1072 = vadd.xlane.f32.xlu1 %v1071_v17 }
 0x1d0   :  { %v691_v20 = vmax.f32 %v579_v14, 0.0  ;;  %v600_v27 = vadd.f32 %v1673_v35, %v2413_v29  ;;  %v1027_v25 = vmul.f32 %v2419_v58, %v693_v12  ;;  %v1065_v49 = vsel %vm1052_vm0, %v1024_v52, 0.0 }
 0x1d1   :  { %v591_v23 = vpop.f32.mrf.mxu1 }
 0x1d2   :  { %v696_v24 = vmax.f32 %v600_v27, 0.0  ;;  %v592_v50 = vadd.f32 %v2413_v29, %v591_v23  ;;  %v1074_v33 = vsel %vm1052_vm0, %v1027_v25, 0.0  ;;  %v1025_v26 = vmul.f32 %v2419_v58, %v691_v20 }
 0x1d3   :  { %v1674_v53 = vpop.f32.mrf.mxu1  ;;  %1075 = vadd.xlane.f32.xlu0 %v1074_v33  ;;  %1066 = vadd.xlane.f32.xlu1 %v1065_v49 }
 0x1d4   :  { %v694_v28 = vmax.f32 %v592_v50, 0.0  ;;  %v603_v54 = vadd.f32 %v1674_v53, %v2413_v29  ;;  %v1030_v30 = vmul.f32 %v2419_v58, %v696_v24  ;;  %v1068_v40 = vsel %vm1052_vm0, %v1025_v26, 0.0 }
 0x1d5   :  { %v594_v39 = vpop.f32.mrf.mxu1 }
 0x1d6   :  { %v697_v32 = vmax.f32 %v603_v54, 0.0  ;;  %v595_v61 = vadd.f32 %v2413_v29, %v594_v39  ;;  %v1083_v37 = vsel %vm1052_vm0, %v1030_v30, 0.0  ;;  %v1028_v55 = vmul.f32 %v2419_v58, %v694_v28 }
 0x1d7   :  { %v1677_v46 = vpop.f32.mrf.mxu1  ;;  %1069 = vadd.xlane.f32.xlu0 %v1068_v40  ;;  %1084 = vadd.xlane.f32.xlu1 %v1083_v37 }
 0x1d8   :  { %v695_v51 = vmax.f32 %v595_v61, 0.0  ;;  %v616_v56 = vadd.f32 %v1677_v46, %v2413_v29  ;;  %v1031_v15 = vmul.f32 %v2419_v58, %v697_v32  ;;  %v1077_v59 = vsel %vm1052_vm0, %v1028_v55, 0.0 }
 0x1d9   :  { %v607_v16 = vpop.f32.mrf.mxu1 }
 0x1da   :  { %v700_v36 = vmax.f32 %v616_v56, 0.0  ;;  %v608_v34 = vadd.f32 %v2413_v29, %v607_v16  ;;  %v1086_v57 = vsel %vm1052_vm0, %v1031_v15, 0.0  ;;  %v1029_v21 = vmul.f32 %v2419_v58, %v695_v51  ;;  %v2489_v56 = vpop.xlane.xlu0 %949 }
 0x1db   :  { %v1678_v60 = vpop.f32.mrf.mxu1  ;;  %1087 = vadd.xlane.f32.xlu0 %v1086_v57  ;;  %1078 = vadd.xlane.f32.xlu1 %v1077_v59 }
 0x1dc   :  { %v698_v3 = vmax.f32 %v608_v34, 0.0  ;;  %v619_v22 = vadd.f32 %v1678_v60, %v2413_v29  ;;  %v1034_v4 = vmul.f32 %v2419_v58, %v700_v36  ;;  %v1080_v38 = vsel %vm1052_vm0, %v1029_v21, 0.0 }
 0x1dd   :  { %v610_v13 = vpop.f32.mrf.mxu1 }
 0x1de   :  { %v701_v62 = vmax.f32 %v619_v22, 0.0  ;;  %v611_v0 = vadd.f32 %v2413_v29, %v610_v13  ;;  %v1095_v41 = vsel %vm1052_vm0, %v1034_v4, 0.0  ;;  %v1032_v63 = vmul.f32 %v2419_v58, %v698_v3 }
 0x1df   :  { %v1681_v42 = vpop.f32.mrf.mxu1  ;;  %1081 = vadd.xlane.f32.xlu0 %v1080_v38  ;;  %1096 = vadd.xlane.f32.xlu1 %v1095_v41 }
 0x1e0   :  { %v699_v1 = vmax.f32 %v611_v0, 0.0  ;;  %v632_v2 = vadd.f32 %v1681_v42, %v2413_v29  ;;  %v1035_v44 = vmul.f32 %v2419_v58, %v701_v62  ;;  %v1089_v31 = vsel %vm1052_vm0, %v1032_v63, 0.0  ;;  %v2501_v63 = vpop.xlane.xlu0 %953 }
 0x1e1   :  { %v623_v45 = vpop.f32.mrf.mxu1 }
 0x1e2   :  { %v704_v8 = vmax.f32 %v632_v2, 0.0  ;;  %v624_v18 = vadd.f32 %v2413_v29, %v623_v45  ;;  %v1098_v19 = vsel %vm1052_vm0, %v1035_v44, 0.0  ;;  %v1033_v9 = vmul.f32 %v2419_v58, %v699_v1  ;;  %v2505_v45 = vpop.xlane.xlu1 %951 }
 0x1e3   :  { %v1682_v7 = vpop.f32.mrf.mxu1  ;;  %1099 = vadd.xlane.f32.xlu0 %v1098_v19  ;;  %1090 = vadd.xlane.f32.xlu1 %v1089_v31 }
 0x1e4   :  { %v702_v5 = vmax.f32 %v624_v18, 0.0  ;;  %v635_v43 = vadd.f32 %v1682_v7, %v2413_v29  ;;  %v1038_v10 = vmul.f32 %v2419_v58, %v704_v8  ;;  %v1092_v6 = vsel %vm1052_vm0, %v1033_v9, 0.0 }
 0x1e5   :  { %v626_v11 = vpop.f32.mrf.mxu1 }
 0x1e6   :  { %v705_v47 = vmax.f32 %v635_v43, 0.0  ;;  %v627_v48 = vadd.f32 %v2413_v29, %v626_v11  ;;  %v1107_v12 = vsel %vm1052_vm0, %v1038_v10, 0.0  ;;  %v1036_v14 = vmul.f32 %v2419_v58, %v702_v5  ;;  %v956_v11 = vpop.xlane.xlu0 %955 }
 0x1e7   :  { %v1685_v17 = vpop.f32.mrf.mxu1  ;;  %1093 = vadd.xlane.f32.xlu0 %v1092_v6  ;;  %1108 = vadd.xlane.f32.xlu1 %v1107_v12  ;;  %v2512_v6 = vpop.xlane.xlu1 %957 }
 0x1e8   :  { %v703_v52 = vmax.f32 %v627_v48, 0.0  ;;  %v648_v35 = vadd.f32 %v1685_v17, %v2413_v29  ;;  %v1039_v20 = vmul.f32 %v2419_v58, %v705_v47  ;;  %v1101_v25 = vsel %vm1052_vm0, %v1036_v14, 0.0 }
 0x1e9   :  { %v639_v27 = vpop.f32.mrf.mxu1 }
 0x1ea   :  { %v708_v23 = vmax.f32 %v648_v35, 0.0  ;;  %v640_v49 = vadd.f32 %v2413_v29, %v639_v27  ;;  %v1110_v24 = vsel %vm1052_vm0, %v1039_v20, 0.0  ;;  %v1037_v50 = vmul.f32 %v2419_v58, %v703_v52 }
 0x1eb   :  { %v1686_v33 = vpop.f32.mrf.mxu1  ;;  %1111 = vadd.xlane.f32.xlu0 %v1110_v24  ;;  %1102 = vadd.xlane.f32.xlu1 %v1101_v25  ;;  %v2520_v25 = vpop.xlane.xlu0 %959 }
 0x1ec   :  { %v706_v26 = vmax.f32 %v640_v49, 0.0  ;;  %v651_v53 = vadd.f32 %v1686_v33, %v2413_v29  ;;  %v1042_v28 = vmul.f32 %v2419_v58, %v708_v23  ;;  %v1104_v30 = vsel %vm1052_vm0, %v1037_v50, 0.0 }
 0x1ed   :  { %v642_v54 = vpop.f32.mrf.mxu1 }
 0x1ee   :  { %v709_v39 = vmax.f32 %v651_v53, 0.0  ;;  %v643_v40 = vadd.f32 %v2413_v29, %v642_v54  ;;  %v1119_v32 = vsel %vm1052_vm0, %v1042_v28, 0.0  ;;  %v1040_v61 = vmul.f32 %v2419_v58, %v706_v26 }
 0x1ef   :  { %v1689_v37 = vpop.f32.mrf.mxu1  ;;  %1105 = vadd.xlane.f32.xlu0 %v1104_v30  ;;  %1120 = vadd.xlane.f32.xlu1 %v1119_v32  ;;  %v964_v33 = vpop.xlane.xlu0 %963 }
 0x1f0   :  { %v707_v55 = vmax.f32 %v643_v40, 0.0  ;;  %v664_v46 = vadd.f32 %v1689_v37, %v2413_v29  ;;  %v1043_v51 = vmul.f32 %v2419_v58, %v709_v39  ;;  %v1113_v16 = vsel %vm1052_vm0, %v1040_v61, 0.0 }
 0x1f1   :  { %v655_v15 = vpop.f32.mrf.mxu1 }
 0x1f2   :  { %v712_v59 = vmax.f32 %v664_v46, 0.0  ;;  %v656_v36 = vadd.f32 %v2413_v29, %v655_v15  ;;  %v1122_v34 = vsel %vm1052_vm0, %v1043_v51, 0.0  ;;  %v1041_v57 = vmul.f32 %v2419_v58, %v707_v55 }
 0x1f3   :  { %v1690_v21 = vpop.f32.mrf.mxu1  ;;  %1123 = vadd.xlane.f32.xlu0 %v1122_v34  ;;  %1114 = vadd.xlane.f32.xlu1 %v1113_v16  ;;  %v2528_v53 = vpop.xlane.xlu0 %967 }
 0x1f4   :  { %v710_v60 = vmax.f32 %v656_v36, 0.0  ;;  %v667_v3 = vadd.f32 %v1690_v21, %v2413_v29  ;;  %v1046_v22 = vmul.f32 %v2419_v58, %v712_v59  ;;  %v1116_v13 = vsel %vm1052_vm0, %v1041_v57, 0.0 }
 0x1f5   :  { %v658_v4 = vpop.f32.mrf.mxu1 }
 0x1f6   :  { %v713_v38 = vmax.f32 %v667_v3, 0.0  ;;  %v659_v62 = vadd.f32 %v2413_v29, %v658_v4  ;;  %v1131_v0 = vsel %vm1052_vm0, %v1046_v22, 0.0  ;;  %v1044_v41 = vmul.f32 %v2419_v58, %v710_v60  ;;  %v2572_v4 = vld [vmem:[#allocation2] ss:$0 sm:$0xff] }
 0x1f7   :  { %v1693_v42 = vpop.f32.mrf.mxu1  ;;  %1117 = vadd.xlane.f32.xlu0 %v1116_v13  ;;  %1132 = vadd.xlane.f32.xlu1 %v1131_v0  ;;  %v2530_v54 = vpop.xlane.xlu0 %971 }
 0x1f8   :  { %v711_v1 = vmax.f32 %v659_v62, 0.0  ;;  %v680_v2 = vadd.f32 %v1693_v42, %v2413_v29  ;;  %v1047_v44 = vmul.f32 %v2419_v58, %v713_v38  ;;  %v1125_v19 = vsel %vm1052_vm0, %v1044_v41, 0.0 }
 0x1f9   :  { %v671_v31 = vpop.f32.mrf.mxu1 }
 0x1fa   :  { %v672_v8 = vadd.f32 %v2413_v29, %v671_v31  ;;  %v1134_v18 = vsel %vm1052_vm0, %v1047_v44, 0.0  ;;  %v1045_v9 = vmul.f32 %v2419_v58, %v711_v1  ;;  %v716_v5 = vmax.f32 %v680_v2, 0.0 }
 0x1fb   :  { %v1694_v7 = vpop.f32.mrf.mxu1  ;;  %1135 = vadd.xlane.f32.xlu0 %v1134_v18  ;;  %1126 = vadd.xlane.f32.xlu1 %v1125_v19 }
 0x1fc   :  { %v714_v43 = vmax.f32 %v672_v8, 0.0  ;;  %v683_v10 = vadd.f32 %v1694_v7, %v2413_v29  ;;  %v1128_v14 = vsel %vm1052_vm0, %v1045_v9, 0.0  ;;  %v1050_v20 = vmul.f32 %v2419_v58, %v716_v5 }
 0x1fd   :  { %v674_v47 = vpop.f32.mrf.mxu1 }
 0x1fe   :  { %v717_v48 = vmax.f32 %v683_v10, 0.0  ;;  %v675_v12 = vadd.f32 %v2413_v29, %v674_v47  ;;  %v1048_v17 = vmul.f32 %v2419_v58, %v714_v43  ;;  %v962_v29 = vpop.xlane.xlu1 %961  ;;  %v1143_v50 = vsel %vm1052_vm0, %v1050_v20, 0.0 }
 0x1ff   :  { %1129 = vadd.xlane.f32.xlu0 %v1128_v14 }
 0x200   :  { %v715_v52 = vmax.f32 %v675_v12, 0.0  ;;  %v1137_v35 = vsel %vm1052_vm0, %v1048_v17, 0.0  ;;  %v1051_v27 = vmul.f32 %v2419_v58, %v717_v48 }
 0x201   :  { %1138 = vadd.xlane.f32.xlu1 %v1137_v35 }
 0x202   :  { %v1049_v23 = vmul.f32 %v2419_v58, %v715_v52  ;;  %v1146_v49 = vsel %vm1052_vm0, %v1051_v27, 0.0  ;;  %v2526_v26 = vpop.xlane.xlu1 %965  ;;  %v2534_v58 = vpop.xlane.xlu0 %975 }
 0x204   :  { %v1140_v24 = vsel %vm1052_vm0, %v1049_v23, 0.0 }
 0x205   :  { %1141 = vadd.xlane.f32.xlu0 %v1140_v24  ;;  %1144 = vadd.xlane.f32.xlu1 %v1143_v50 }
 0x206   :  { %v970_v28 = vpop.xlane.xlu1 %969  ;;  %v2538_v40 = vpop.xlane.xlu0 %979 }
 0x209   :  { %1147 = vadd.xlane.f32.xlu0 %v1146_v49 }
 0x20a   :  { %v2532_v30 = vpop.xlane.xlu1 %973  ;;  %v2542_v61 = vpop.xlane.xlu0 %983 }
 0x20e   :  { %v2536_v39 = vpop.xlane.xlu1 %977  ;;  %v2546_v55 = vpop.xlane.xlu0 %987 }
 0x212   :  { %v2540_v32 = vpop.xlane.xlu1 %981  ;;  %v2550_v51 = vpop.xlane.xlu0 %991 }
 0x216   :  { %v2544_v37 = vpop.xlane.xlu1 %985  ;;  %v2554_v16 = vpop.xlane.xlu0 %995 }
 0x21a   :  { %v2548_v46 = vpop.xlane.xlu1 %989  ;;  %v2558_v36 = vpop.xlane.xlu0 %999 }
 0x21e   :  { %v2552_v15 = vpop.xlane.xlu1 %993  ;;  %v2562_v57 = vpop.xlane.xlu0 %1003 }
 0x222   :  { %v2556_v59 = vpop.xlane.xlu1 %997  ;;  %v2566_v60 = vpop.xlane.xlu0 %1007 }
 0x226   :  { %v2560_v34 = vpop.xlane.xlu1 %1001  ;;  %v2570_v22 = vpop.xlane.xlu0 %1011 }
 0x22a   :  { %v2564_v21 = vpop.xlane.xlu1 %1005 }
 0x22e   :  { %v2568_v3 = vpop.xlane.xlu1 %1009 }
 0x250   :  { %v1061_v13 = vpop.xlane.xlu1 %1060 }
 0x251   :  { %v1151_v38 = vadd.f32 %v1061_v13, %v2501_v63 }
 0x253   :  { %v1190_v62 = vadd.f32 %v2572_v4, %v1151_v38 }
 0x254   :  { %v1064_v0 = vpop.xlane.xlu0 %1063  ;;  %v1055_v41 = vpop.xlane.xlu1 %1054 }
 0x255   :  { %v1521_v42 = vmul.f32 -1.442695, %v1190_v62  ;;  %v1152_v1 = vadd.f32 %v1064_v0, %v956_v11  ;;  %v1149_v2 = vadd.f32 %v1055_v41, %v2489_v56 }
 0x257   :  { %1811 = vpow2.f32 %v1521_v42  ;;  %v1191_v44 = vadd.f32 %v2572_v4, %v1152_v1  ;;  %v1188_v31 = vadd.f32 %v2572_v4, %v1149_v2 }
 0x258   :  { %v1058_v8 = vpop.xlane.xlu0 %1057  ;;  %v1073_v18 = vpop.xlane.xlu1 %1072 }
 0x259   :  { %v1522_v19 = vmul.f32 -1.442695, %v1191_v44  ;;  %v1519_v9 = vmul.f32 -1.442695, %v1188_v31  ;;  %v1150_v7 = vadd.f32 %v1058_v8, %v2505_v45  ;;  %v1155_v63 = vadd.f32 %v1073_v18, %v962_v29 }
 0x25b   :  { %1813 = vpow2.f32 %v1522_v19  ;;  %v1189_v5 = vadd.f32 %v2572_v4, %v1150_v7  ;;  %v1194_v43 = vadd.f32 %v2572_v4, %v1155_v63 }
 0x25c   :  { %1815 = vpow2.f32 %v1519_v9  ;;  %v1076_v10 = vpop.xlane.xlu0 %1075  ;;  %v1067_v56 = vpop.xlane.xlu1 %1066 }
 0x25d   :  { %v1520_v11 = vmul.f32 -1.442695, %v1189_v5  ;;  %v1525_v47 = vmul.f32 -1.442695, %v1194_v43  ;;  %v1156_v48 = vadd.f32 %v1076_v10, %v964_v33  ;;  %v1153_v12 = vadd.f32 %v1067_v56, %v2512_v6 }
 0x25f   :  { %1817 = vpow2.f32 %v1520_v11  ;;  %v1195_v14 = vadd.f32 %v2572_v4, %v1156_v48  ;;  %v1192_v17 = vadd.f32 %v2572_v4, %v1153_v12 }
 0x260   :  { %1819 = vpow2.f32 %v1525_v47  ;;  %v1070_v45 = vpop.xlane.xlu0 %1069  ;;  %v1085_v52 = vpop.xlane.xlu1 %1084 }
 0x261   :  { %v1526_v35 = vmul.f32 -1.442695, %v1195_v14  ;;  %v1523_v20 = vmul.f32 -1.442695, %v1192_v17  ;;  %v1154_v27 = vadd.f32 %v1070_v45, %v2520_v25  ;;  %v1159_v23 = vadd.f32 %v1085_v52, %v970_v28 }
 0x263   :  { %1821 = vpow2.f32 %v1526_v35  ;;  %v1193_v49 = vadd.f32 %v2572_v4, %v1154_v27  ;;  %v1198_v29 = vadd.f32 %v2572_v4, %v1159_v23 }
 0x264   :  { %v1812_v24 = vpop.eup %1811  ;;  %1823 = vpow2.f32 %v1523_v20  ;;  %v1088_v6 = vpop.xlane.xlu0 %1087 }
 0x265   :  { %v1079_v50 = vpop.xlane.xlu1 %1078  ;;  %v1318_v33 = vadd.f32 1.0, %v1812_v24  ;;  %v1524_v13 = vmul.f32 -1.442695, %v1193_v49  ;;  %v1529_v38 = vmul.f32 -1.442695, %v1198_v29  ;;  %v1160_v62 = vadd.f32 %v1088_v6, %v2530_v54 }
 0x266   :  { %v1157_v0 = vadd.f32 %v1079_v50, %v2526_v26 }
 0x267   :  { %1825 = vrcp.f32 %v1318_v33  ;;  %v1199_v25 = vadd.f32 %v2572_v4, %v1160_v62 }
 0x268   :  { %v1814_v28 = vpop.eup %1813  ;;  %1827 = vpow2.f32 %v1524_v13  ;;  %v1196_v41 = vadd.f32 %v2572_v4, %v1157_v0  ;;  %v1082_v42 = vpop.xlane.xlu0 %1081 }
 0x269   :  { %v1097_v1 = vpop.xlane.xlu1 %1096  ;;  %v1816_v2 = vpop.eup %1815  ;;  %v1319_v44 = vadd.f32 1.0, %v1814_v28  ;;  %1829 = vpow2.f32 %v1529_v38  ;;  %v1530_v31 = vmul.f32 -1.442695, %v1199_v25  ;;  %v1158_v8 = vadd.f32 %v1082_v42, %v2528_v53 }
 0x26a   :  { %v1316_v18 = vadd.f32 1.0, %v1816_v2  ;;  %v1527_v19 = vmul.f32 -1.442695, %v1196_v41  ;;  %v1163_v54 = vadd.f32 %v1097_v1, %v2536_v39 }
 0x26b   :  { %1831 = vrcp.f32 %v1319_v44  ;;  %v1197_v26 = vadd.f32 %v2572_v4, %v1158_v8 }
 0x26c   :  { %v1818_v9 = vpop.eup %1817  ;;  %1833 = vrcp.f32 %v1316_v18  ;;  %v1202_v7 = vadd.f32 %v2572_v4, %v1163_v54  ;;  %v1100_v63 = vpop.xlane.xlu0 %1099 }
 0x26d   :  { %v1091_v5 = vpop.xlane.xlu1 %1090  ;;  %v1820_v43 = vpop.eup %1819  ;;  %v1317_v10 = vadd.f32 1.0, %v1818_v9  ;;  %1835 = vpow2.f32 %v1530_v31  ;;  %v1528_v56 = vmul.f32 -1.442695, %v1197_v26  ;;  %v1164_v11 = vadd.f32 %v1100_v63, %v2538_v40 }
 0x26e   :  { %v1322_v53 = vadd.f32 1.0, %v1820_v43  ;;  %1837 = vpow2.f32 %v1527_v19  ;;  %v1533_v47 = vmul.f32 -1.442695, %v1202_v7  ;;  %v1161_v39 = vadd.f32 %v1091_v5, %v2532_v30 }
 0x26f   :  { %1839 = vrcp.f32 %v1317_v10  ;;  %v1203_v48 = vadd.f32 %v2572_v4, %v1164_v11 }
 0x270   :  { %v1822_v12 = vpop.eup %1821  ;;  %1841 = vrcp.f32 %v1322_v53  ;;  %v1200_v14 = vadd.f32 %v2572_v4, %v1161_v39  ;;  %v1094_v17 = vpop.xlane.xlu0 %1093 }
 0x271   :  { %v1109_v45 = vpop.xlane.xlu1 %1108  ;;  %v1824_v52 = vpop.eup %1823  ;;  %v1323_v35 = vadd.f32 1.0, %v1822_v12  ;;  %1843 = vpow2.f32 %v1528_v56  ;;  %v1534_v20 = vmul.f32 -1.442695, %v1203_v48  ;;  %v1162_v40 = vadd.f32 %v1094_v17, %v2534_v58 }
 0x272   :  { %v1320_v27 = vadd.f32 1.0, %v1824_v52  ;;  %1845 = vpow2.f32 %v1533_v47  ;;  %v1531_v23 = vmul.f32 -1.442695, %v1200_v14  ;;  %v1167_v30 = vadd.f32 %v1109_v45, %v2544_v37 }
 0x273   :  { %1847 = vrcp.f32 %v1323_v35  ;;  %v1201_v49 = vadd.f32 %v2572_v4, %v1162_v40 }
 0x274   :  { %v1826_v29 = vpop.eup %1825  ;;  %1849 = vrcp.f32 %v1320_v27  ;;  %v1206_v24 = vadd.f32 %v2572_v4, %v1167_v30  ;;  %v1112_v6 = vpop.xlane.xlu0 %1111 }
 0x275   :  { %v1103_v50 = vpop.xlane.xlu1 %1102  ;;  %v1828_v33 = vpop.eup %1827  ;;  %v1414_v13 = vmul.f32 5.0, %v1826_v29  ;;  %1851 = vpow2.f32 %v1534_v20  ;;  %v1532_v38 = vmul.f32 -1.442695, %v1201_v49  ;;  %v1168_v58 = vadd.f32 %v1112_v6, %v2546_v55 }
 0x276   :  { %v1830_v62 = vpop.eup %1829  ;;  %v1321_v0 = vadd.f32 1.0, %v1828_v33  ;;  %1853 = vpow2.f32 %v1531_v23  ;;  %v1537_v37 = vmul.f32 -1.442695, %v1206_v24  ;;  %v1165_v25 = vadd.f32 %v1103_v50, %v2540_v32 }
 0x277   :  { %1447 = vst.msk [vmem:[%s2770_s8 + $0x10] sm:$0xff] %vm1444_vm1, %v1414_v13  ;;  %v1326_v28 = vadd.f32 1.0, %v1830_v62  ;;  %1855 = vpow2.f32 %v1532_v38  ;;  %v1207_v41 = vadd.f32 %v2572_v4, %v1168_v58 }
 0x278   :  { %v1832_v42 = vpop.eup %1831  ;;  %1857 = vrcp.f32 %v1321_v0  ;;  %v1204_v1 = vadd.f32 %v2572_v4, %v1165_v25  ;;  %v1106_v55 = vpop.xlane.xlu0 %1105 }
 0x279   :  { %v1121_v2 = vpop.xlane.xlu1 %1120  ;;  %v1834_v44 = vpop.eup %1833  ;;  %v1415_v31 = vmul.f32 5.0, %v1832_v42  ;;  %1859 = vrcp.f32 %v1326_v28  ;;  %v1538_v8 = vmul.f32 -1.442695, %v1207_v41  ;;  %v1166_v32 = vadd.f32 %v1106_v55, %v2542_v61 }
 0x27a   :  { %v1836_v18 = vpop.eup %1835  ;;  %v1412_v19 = vmul.f32 5.0, %v1834_v44  ;;  %1861 = vpow2.f32 %v1537_v37  ;;  %v1535_v54 = vmul.f32 -1.442695, %v1204_v1  ;;  %v1171_v26 = vadd.f32 %v1121_v2, %v2552_v15 }
 0x27b   :  { %v1838_v9 = vpop.eup %1837  ;;  %1448 = vst.msk [vmem:[%s2770_s8 + $0x18] sm:$0xff] %vm1444_vm1, %v1415_v31  ;;  %v1327_v7 = vadd.f32 1.0, %v1836_v18  ;;  %1863 = vpow2.f32 %v1538_v8  ;;  %v1205_v63 = vadd.f32 %v2572_v4, %v1166_v32 }
 0x27c   :  { %v1840_v5 = vpop.eup %1839  ;;  %1445 = vst.msk [vmem:[%s2770_s8] sm:$0xff] %vm1444_vm1, %v1412_v19  ;;  %v1324_v61 = vadd.f32 1.0, %v1838_v9  ;;  %1865 = vpow2.f32 %v1535_v54  ;;  %v1210_v15 = vadd.f32 %v2572_v4, %v1171_v26  ;;  %v1124_v43 = vpop.xlane.xlu0 %1123 }
 0x27d   :  { %v1115_v10 = vpop.xlane.xlu1 %1114  ;;  %v1842_v56 = vpop.eup %1841  ;;  %v1413_v11 = vmul.f32 5.0, %v1840_v5  ;;  %1867 = vrcp.f32 %v1327_v7  ;;  %v1536_v53 = vmul.f32 -1.442695, %v1205_v63  ;;  %v1172_v47 = vadd.f32 %v1124_v43, %v2554_v16 }
 0x27e   :  { %v1844_v39 = vpop.eup %1843  ;;  %v1418_v48 = vmul.f32 5.0, %v1842_v56  ;;  %1869 = vrcp.f32 %v1324_v61  ;;  %v1541_v12 = vmul.f32 -1.442695, %v1210_v15  ;;  %v1169_v14 = vadd.f32 %v1115_v10, %v2548_v46 }
 0x27f   :  { %v1846_v17 = vpop.eup %1845  ;;  %1446 = vst.msk [vmem:[%s2770_s8 + $0x8] sm:$0xff] %vm1444_vm1, %v1413_v11  ;;  %v1325_v45 = vadd.f32 1.0, %v1844_v39  ;;  %1871 = vpow2.f32 %v1536_v53  ;;  %v1211_v52 = vadd.f32 %v2572_v4, %v1172_v47 }
 0x280   :  { %v1848_v35 = vpop.eup %1847  ;;  %1451 = vst.msk [vmem:[%s2770_s8 + $0x30] sm:$0xff] %vm1444_vm1, %v1418_v48  ;;  %v1330_v16 = vadd.f32 1.0, %v1846_v17  ;;  %1873 = vpow2.f32 %v1541_v12  ;;  %v1208_v46 = vadd.f32 %v2572_v4, %v1169_v14  ;;  %v1118_v20 = vpop.xlane.xlu0 %1117 }
 0x281   :  { %v1133_v40 = vpop.xlane.xlu1 %1132  ;;  %v1850_v27 = vpop.eup %1849  ;;  %v1419_v23 = vmul.f32 5.0, %v1848_v35  ;;  %1875 = vrcp.f32 %v1325_v45  ;;  %v1542_v30 = vmul.f32 -1.442695, %v1211_v52  ;;  %v1170_v49 = vadd.f32 %v1118_v20, %v2550_v51 }
 0x282   :  { %v1852_v29 = vpop.eup %1851  ;;  %v1416_v24 = vmul.f32 5.0, %v1850_v27  ;;  %1877 = vrcp.f32 %v1330_v16  ;;  %v1539_v6 = vmul.f32 -1.442695, %v1208_v46  ;;  %v1175_v50 = vadd.f32 %v1133_v40, %v2560_v34 }
 0x283   :  { %v1854_v33 = vpop.eup %1853  ;;  %1452 = vst.msk [vmem:[%s2770_s8 + $0x38] sm:$0xff] %vm1444_vm1, %v1419_v23  ;;  %v1331_v13 = vadd.f32 1.0, %v1852_v29  ;;  %1879 = vpow2.f32 %v1542_v30  ;;  %v1209_v38 = vadd.f32 %v2572_v4, %v1170_v49 }
 0x284   :  { %v1856_v58 = vpop.eup %1855  ;;  %1449 = vst.msk [vmem:[%s2770_s8 + $0x20] sm:$0xff] %vm1444_vm1, %v1416_v24  ;;  %v1328_v51 = vadd.f32 1.0, %v1854_v33  ;;  %1881 = vpow2.f32 %v1539_v6  ;;  %v1214_v34 = vadd.f32 %v2572_v4, %v1175_v50  ;;  %v1136_v62 = vpop.xlane.xlu0 %1135 }
 0x285   :  { %v1127_v0 = vpop.xlane.xlu1 %1126  ;;  %v1858_v37 = vpop.eup %1857  ;;  %1883 = vrcp.f32 %v1331_v13  ;;  %v1329_v25 = vadd.f32 1.0, %v1856_v58  ;;  %v1540_v28 = vmul.f32 -1.442695, %v1209_v38  ;;  %v1176_v41 = vadd.f32 %v1136_v62, %v2562_v57 }
 0x286   :  { %v1860_v42 = vpop.eup %1859  ;;  %v1417_v1 = vmul.f32 5.0, %v1858_v37  ;;  %1885 = vrcp.f32 %v1328_v51  ;;  %v1545_v55 = vmul.f32 -1.442695, %v1214_v34  ;;  %v1173_v2 = vadd.f32 %v1127_v0, %v2556_v59 }
 0x287   :  { %v1862_v44 = vpop.eup %1861  ;;  %v1422_v31 = vmul.f32 5.0, %v1860_v42  ;;  %1887 = vrcp.f32 %v1329_v25  ;;  %v1215_v8 = vadd.f32 %v2572_v4, %v1176_v41 }
 0x288   :  { %v1864_v32 = vpop.eup %1863  ;;  %1450 = vst.msk [vmem:[%s2770_s8 + $0x28] sm:$0xff] %vm1444_vm1, %v1417_v1  ;;  %v1334_v18 = vadd.f32 1.0, %v1862_v44  ;;  %1889 = vpow2.f32 %v1540_v28  ;;  %v1212_v57 = vadd.f32 %v2572_v4, %v1173_v2  ;;  %v1130_v19 = vpop.xlane.xlu0 %1129 }
 0x289   :  { %v1866_v54 = vpop.eup %1865  ;;  %1455 = vst.msk [vmem:[%s2770_s8 + $0x50] sm:$0xff] %vm1444_vm1, %v1422_v31  ;;  %v1335_v59 = vadd.f32 1.0, %v1864_v32  ;;  %1891 = vpow2.f32 %v1545_v55  ;;  %v1546_v26 = vmul.f32 -1.442695, %v1215_v8  ;;  %v1174_v9 = vadd.f32 %v1130_v19, %v2558_v36 }
 0x28a   :  { %v1868_v7 = vpop.eup %1867  ;;  %1893 = vrcp.f32 %v1334_v18  ;;  %v1332_v63 = vadd.f32 1.0, %v1866_v54  ;;  %v1543_v5 = vmul.f32 -1.442695, %v1212_v57  ;;  %v1139_v61 = vpop.xlane.xlu1 %1138 }
 0x28b   :  { %v1870_v15 = vpop.eup %1869  ;;  %v1423_v43 = vmul.f32 5.0, %v1868_v7  ;;  %1895 = vrcp.f32 %v1335_v59  ;;  %v1213_v10 = vadd.f32 %v2572_v4, %v1174_v9  ;;  %v1177_v56 = vadd.f32 %v1139_v61, %v2564_v21 }
 0x28c   :  { %v1872_v11 = vpop.eup %1871  ;;  %v1420_v53 = vmul.f32 5.0, %v1870_v15  ;;  %1897 = vrcp.f32 %v1332_v63 }
 0x28d   :  { %v1874_v47 = vpop.eup %1873  ;;  %1456 = vst.msk [vmem:[%s2770_s8 + $0x58] sm:$0xff] %vm1444_vm1, %v1423_v43  ;;  %v1333_v36 = vadd.f32 1.0, %v1872_v11  ;;  %1899 = vpow2.f32 %v1546_v26  ;;  %v1544_v39 = vmul.f32 -1.442695, %v1213_v10  ;;  %v1216_v48 = vadd.f32 %v2572_v4, %v1177_v56 }
 0x28e   :  { %v1876_v12 = vpop.eup %1875  ;;  %1453 = vst.msk [vmem:[%s2770_s8 + $0x40] sm:$0xff] %vm1444_vm1, %v1420_v53  ;;  %v1338_v21 = vadd.f32 1.0, %v1874_v47  ;;  %1901 = vpow2.f32 %v1543_v5  ;;  %v1142_v14 = vpop.xlane.xlu0 %1141 }
 0x28f   :  { %v1145_v17 = vpop.xlane.xlu1 %1144  ;;  %v1878_v45 = vpop.eup %1877  ;;  %v1421_v52 = vmul.f32 5.0, %v1876_v12  ;;  %1903 = vrcp.f32 %v1333_v36  ;;  %v1547_v35 = vmul.f32 -1.442695, %v1216_v48  ;;  %v1178_v16 = vadd.f32 %v1142_v14, %v2566_v60 }
 0x290   :  { %v1880_v46 = vpop.eup %1879  ;;  %v1426_v20 = vmul.f32 5.0, %v1878_v45  ;;  %1905 = vrcp.f32 %v1338_v21  ;;  %v1179_v40 = vadd.f32 %v1145_v17, %v2568_v3 }
 0x291   :  { %v1882_v27 = vpop.eup %1881  ;;  %1454 = vst.msk [vmem:[%s2770_s8 + $0x48] sm:$0xff] %vm1444_vm1, %v1421_v52  ;;  %v1339_v23 = vadd.f32 1.0, %v1880_v46  ;;  %1907 = vpow2.f32 %v1544_v39  ;;  %v1217_v30 = vadd.f32 %v2572_v4, %v1178_v16 }
 0x292   :  { %v1884_v49 = vpop.eup %1883  ;;  %1459 = vst.msk [vmem:[%s2770_s8 + $0x70] sm:$0xff] %vm1444_vm1, %v1426_v20  ;;  %v1336_v60 = vadd.f32 1.0, %v1882_v27  ;;  %1909 = vpow2.f32 %v1547_v35  ;;  %v1218_v3 = vadd.f32 %v2572_v4, %v1179_v40  ;;  %v1148_v29 = vpop.xlane.xlu0 %1147 }
 0x293   :  { %v1886_v24 = vpop.eup %1885  ;;  %v1427_v6 = vmul.f32 5.0, %v1884_v49  ;;  %1911 = vrcp.f32 %v1339_v23  ;;  %v1548_v50 = vmul.f32 -1.442695, %v1217_v30  ;;  %v1180_v33 = vadd.f32 %v1148_v29, %v2570_v22 }
 0x294   :  { %v1888_v13 = vpop.eup %1887  ;;  %v1424_v38 = vmul.f32 5.0, %v1886_v24  ;;  %1913 = vrcp.f32 %v1336_v60  ;;  %v1549_v58 = vmul.f32 -1.442695, %v1218_v3 }
 0x295   :  { %v1890_v51 = vpop.eup %1889  ;;  %1460 = vst.msk [vmem:[%s2770_s8 + $0x78] sm:$0xff] %vm1444_vm1, %v1427_v6  ;;  %v1425_v34 = vmul.f32 5.0, %v1888_v13  ;;  %1915 = vpow2.f32 %v1548_v50  ;;  %v1219_v62 = vadd.f32 %v2572_v4, %v1180_v33 }
 0x296   :  { %v1892_v0 = vpop.eup %1891  ;;  %1457 = vst.msk [vmem:[%s2770_s8 + $0x60] sm:$0xff] %vm1444_vm1, %v1424_v38  ;;  %v1337_v22 = vadd.f32 1.0, %v1890_v51  ;;  %1917 = vpow2.f32 %v1549_v58 }
 0x297   :  { %v1894_v37 = vpop.eup %1893  ;;  %1458 = vst.msk [vmem:[%s2770_s8 + $0x68] sm:$0xff] %vm1444_vm1, %v1425_v34  ;;  %v1342_v25 = vadd.f32 1.0, %v1892_v0  ;;  %v1550_v28 = vmul.f32 -1.442695, %v1219_v62 }
 0x298   :  { %v1896_v41 = vpop.eup %1895  ;;  %v1430_v42 = vmul.f32 5.0, %v1894_v37  ;;  %1919 = vrcp.f32 %v1337_v22 }
 0x299   :  { %v1898_v4 = vpop.eup %1897  ;;  %v1431_v1 = vmul.f32 5.0, %v1896_v41  ;;  %1921 = vrcp.f32 %v1342_v25 }
 0x29a   :  { %v1900_v55 = vpop.eup %1899  ;;  %1463 = vst.msk [vmem:[%s2770_s8 + $0x90] sm:$0xff] %vm1444_vm1, %v1430_v42  ;;  %v1428_v2 = vmul.f32 5.0, %v1898_v4  ;;  %1923 = vpow2.f32 %v1550_v28 }
 0x29b   :  { %v1902_v44 = vpop.eup %1901  ;;  %1464 = vst.msk [vmem:[%s2770_s8 + $0x98] sm:$0xff] %vm1444_vm1, %v1431_v1  ;;  %v1343_v31 = vadd.f32 1.0, %v1900_v55 }
 0x29c   :  { %v1904_v8 = vpop.eup %1903  ;;  %1461 = vst.msk [vmem:[%s2770_s8 + $0x80] sm:$0xff] %vm1444_vm1, %v1428_v2  ;;  %v1340_v32 = vadd.f32 1.0, %v1902_v44 }
 0x29d   :  { %v1906_v18 = vpop.eup %1905  ;;  %v1429_v57 = vmul.f32 5.0, %v1904_v8  ;;  %1925 = vrcp.f32 %v1343_v31 }
 0x29e   :  { %v1908_v19 = vpop.eup %1907  ;;  %v1434_v54 = vmul.f32 5.0, %v1906_v18  ;;  %1927 = vrcp.f32 %v1340_v32 }
 0x29f   :  { %v1910_v59 = vpop.eup %1909  ;;  %1462 = vst.msk [vmem:[%s2770_s8 + $0x88] sm:$0xff] %vm1444_vm1, %v1429_v57  ;;  %v1341_v26 = vadd.f32 1.0, %v1908_v19 }
 0x2a0   :  { %v1912_v9 = vpop.eup %1911  ;;  %1467 = vst.msk [vmem:[%s2770_s8 + $0xb0] sm:$0xff] %vm1444_vm1, %v1434_v54  ;;  %v1344_v7 = vadd.f32 1.0, %v1910_v59 }
 0x2a1   :  { %v1914_v63 = vpop.eup %1913  ;;  %v1435_v5 = vmul.f32 5.0, %v1912_v9  ;;  %1929 = vrcp.f32 %v1341_v26 }
 0x2a2   :  { %v1916_v61 = vpop.eup %1915  ;;  %v1432_v15 = vmul.f32 5.0, %v1914_v63  ;;  %1931 = vrcp.f32 %v1344_v7 }
 0x2a3   :  { %v1918_v43 = vpop.eup %1917  ;;  %1468 = vst.msk [vmem:[%s2770_s8 + $0xb8] sm:$0xff] %vm1444_vm1, %v1435_v5  ;;  %v1345_v10 = vadd.f32 1.0, %v1916_v61 }
 0x2a4   :  { %1465 = vst.msk [vmem:[%s2770_s8 + $0xa0] sm:$0xff] %vm1444_vm1, %v1432_v15  ;;  %v1346_v56 = vadd.f32 1.0, %v1918_v43 }
 0x2a5   :  { %v1920_v11 = vpop.eup %1919  ;;  %1933 = vrcp.f32 %v1345_v10 }
 0x2a6   :  { %v1922_v53 = vpop.eup %1921  ;;  %v1433_v47 = vmul.f32 5.0, %v1920_v11  ;;  %1935 = vrcp.f32 %v1346_v56 }
 0x2a7   :  { %v1924_v36 = vpop.eup %1923  ;;  %v1438_v39 = vmul.f32 5.0, %v1922_v53 }
 0x2a8   :  { %1466 = vst.msk [vmem:[%s2770_s8 + $0xa8] sm:$0xff] %vm1444_vm1, %v1433_v47  ;;  %v1347_v48 = vadd.f32 1.0, %v1924_v36 }
 0x2a9   :  { %1471 = vst.msk [vmem:[%s2770_s8 + $0xd0] sm:$0xff] %vm1444_vm1, %v1438_v39 }
 0x2aa   :  { %v1926_v12 = vpop.eup %1925  ;;  %1937 = vrcp.f32 %v1347_v48 }
 0x2ab   :  { %v1928_v21 = vpop.eup %1927  ;;  %v1439_v14 = vmul.f32 5.0, %v1926_v12 }
 0x2ac   :  { %v1436_v17 = vmul.f32 5.0, %v1928_v21 }
 0x2ad   :  { %1472 = vst.msk [vmem:[%s2770_s8 + $0xd8] sm:$0xff] %vm1444_vm1, %v1439_v14 }
 0x2ae   :  { %v1930_v45 = vpop.eup %1929  ;;  %1469 = vst.msk [vmem:[%s2770_s8 + $0xc0] sm:$0xff] %vm1444_vm1, %v1436_v17 }
 0x2af   :  { %v1932_v52 = vpop.eup %1931  ;;  %v1437_v35 = vmul.f32 5.0, %v1930_v45 }
 0x2b0   :  { %v1440_v16 = vmul.f32 5.0, %v1932_v52 }
 0x2b1   :  { %1470 = vst.msk [vmem:[%s2770_s8 + $0xc8] sm:$0xff] %vm1444_vm1, %v1437_v35 }
 0x2b2   :  { %v1934_v46 = vpop.eup %1933  ;;  %1473 = vst.msk [vmem:[%s2770_s8 + $0xe0] sm:$0xff] %vm1444_vm1, %v1440_v16 }
 0x2b3   :  { %v1936_v20 = vpop.eup %1935  ;;  %v1441_v40 = vmul.f32 5.0, %v1934_v46 }
 0x2b4   :  { %v1442_v27 = vmul.f32 5.0, %v1936_v20 }
 0x2b5   :  { %1474 = vst.msk [vmem:[%s2770_s8 + $0xe8] sm:$0xff] %vm1444_vm1, %v1441_v40 }
 0x2b6   :  { %1475 = vst.msk [vmem:[%s2770_s8 + $0xf0] sm:$0xff] %vm1444_vm1, %v1442_v27 }
 0x2b7   :  { %v1938_v23 = vpop.eup %1937 }
 0x2b8   :  { %v1443_v30 = vmul.f32 5.0, %v1938_v23 }
 0x2ba   :  { %1476 = vst.msk [vmem:[%s2770_s8 + $0xf8] sm:$0xff] %vm1444_vm1, %v1443_v30 }
 0x2bb   :  { %1481 = vsyncpa [#allocation4], 1 }

</bundles_post_ra>
